<compile_context>
chip_gen: v7x
topology: tpu7x:2x2x1
jax: 0.10.0
libtpu: 0.0.40
codegen_flags: <defaults>
</compile_context>

<pallas_src>
import jax
import jax.numpy as jnp
from jax.experimental import pallas as pl
from jax.experimental.pallas import tpu as pltpu

KSIZE = 7          # SpatialAttention(kernel_size=7)
PAD = 3            # conv zero padding
LANES = 128        # TPU vreg lane width


def _spatial_attention_kernel(band_ref, x_ref, o_ref, pad_ref, red_ref):
    """One batch element per grid step.

    band_ref: VMEM (2*LANES, KSIZE*LANES) bf16  banded 7x7 conv weights
    x_ref:    VMEM (C, H*W)              f32    lane-dense input slab
    o_ref:    VMEM (H, LANES)            f32    sigmoid(conv); lanes [W,128) unused
    pad_ref:  VMEM (H + 2*PAD, 2*LANES)  f32    zero-padded (avg | max) maps
    red_ref:  VMEM (2, H*W)              f32    staging for reduced avg/max rows
    """
    C, HW = x_ref.shape
    H = o_ref.shape[0]
    W = HW // H

    # Zero the conv border ONCE.  The scratch persists across grid steps and
    # later steps only rewrite interior rows [PAD, PAD+H) at lanes [0, W) and
    # [LANES, LANES+W), so the implicit zero padding survives.
    # NOTE(correctness guard): if the interior stores below are ever widened
    # past W lanes, this init must become per-step again.
    @pl.when(pl.program_id(0) == 0)
    def _():
        pad_ref[...] = jnp.zeros_like(pad_ref)

    # ---- fused channel mean + max at full 128-lane width (one pass over C) --
    x = x_ref[...].astype(jnp.float32)
    red_ref[0:1, :] = jnp.sum(x, axis=0, keepdims=True) * (1.0 / C)
    red_ref[1:2, :] = jnp.max(x, axis=0, keepdims=True)

    # ---- scatter the reduced 2-channel map into the padded conv scratch -----
    # avg -> lanes [0, W), max -> lanes [LANES, LANES + W), one (1, W) row at a
    # time (the only lane-sparse work per step, independent of C).
    for i in range(H):
        row = pl.ds(i * W, W)
        pad_ref[PAD + i:PAD + i + 1, 0:W] = red_ref[0:1, row]
        pad_ref[PAD + i:PAD + i + 1, LANES:LANES + W] = red_ref[1:2, row]

    # ---- 7x7 conv as ONE bf16 MXU matmul against the banded weights ---------
    #   prod[r, dh*LANES + j] = pad[r, :] @ band[:, dh*LANES + j]
    #   y[i, j]               = sum_dh prod[i + dh, dh*LANES + j]
    prod = jnp.dot(pad_ref[...].astype(jnp.bfloat16), band_ref[...],
                   preferred_element_type=jnp.float32)  # (H+2*PAD, KSIZE*LANES)

    # Row-shifted tap accumulation on the VPU; two accumulators expose ILP.
    acc0 = prod[0:H, 0:LANES]
    acc1 = prod[1:H + 1, LANES:2 * LANES]
    for dh in range(2, KSIZE):
        blk = prod[dh:dh + H, dh * LANES:(dh + 1) * LANES]
        if dh % 2 == 0:
            acc0 = acc0 + blk
        else:
            acc1 = acc1 + blk

    # Full-width (H, 128) unmasked store; lanes [W, 128) hold sigmoid(0)=0.5
    # garbage that the wrapper slices off.
    o_ref[...] = jax.nn.sigmoid(acc0 + acc1).astype(o_ref.dtype)


def _banded_weight(weight, W):
    """(1, 2, 7, 7) conv weight -> (2*LANES, KSIZE*LANES) bf16 banded matrix.

    band[c*LANES + t, dh*LANES + j] = weight[0, c, dh, t - j + PAD]
    (0 outside the 7 taps and 0 for output columns j >= W), so
    `pad_row @ band` evaluates every row-dh tap of the zero-padded 7x7
    cross-correlation for every output pixel in a single MXU pass.
    """
    wc = weight.reshape(2, KSIZE, KSIZE).astype(jnp.float32)
    t = jnp.arange(LANES)[:, None]            # input (pad) column lane
    j = jnp.arange(W)[None, :]                # output column
    dw = t - j + PAD                          # horizontal tap index
    band = jnp.where((dw >= 0) & (dw < KSIZE),
                     wc[:, :, jnp.clip(dw, 0, KSIZE - 1)],
                     0.0)                                   # (2, 7, LANES, W)
    band = jnp.pad(band, ((0, 0), (0, 0), (0, 0), (0, LANES - W)))
    band = band.transpose(0, 2, 1, 3).reshape(2 * LANES, KSIZE * LANES)
    return band.astype(jnp.bfloat16)


def spatial_attention(x, weight):
    """x: (N, C, H, W); weight: (1, 2, 7, 7) -> (N, 1, H, W) float32."""
    N, C, H, W = x.shape
    assert weight.shape == (1, 2, KSIZE, KSIZE)
    if W > LANES:
        # TODO(synk): tile wide spatial maps (W > 128) along the lane axis.
        raise NotImplementedError("W > 128 requires lane tiling")
    HP = H + 2 * PAD
    HW = H * W

    band = _banded_weight(weight, W)          # (256, 896) bf16, VMEM-resident
    x_flat = x.reshape(N, C, HW)              # free view: W is the minor dim

    # TODO(synk): for very large C (deep ResNet stages), add a C-chunk grid
    # axis with running sum/max accumulators so double-buffered blocks fit
    # v7x's 64 MiB VMEM; for tiny per-element work, process NB > 1 batch
    # elements per grid step to amortize the ~0.35 us per-step overhead
    # (keeping >= 2 grid steps so both v7x TensorCores stay fed).
    out = pl.pallas_call(
        _spatial_attention_kernel,
        out_shape=jax.ShapeDtypeStruct((N, H, LANES), jnp.float32),
        grid=(N,),
        in_specs=[
            # Banded weights: constant index_map -> fetched once, stays in VMEM
            # (bf16 already halves its footprint; Buffered(1) not needed).
            pl.BlockSpec((2 * LANES, KSIZE * LANES), lambda n: (0, 0)),
            # One lane-dense (C, H*W) batch element per step, no HBM padding.
            pl.BlockSpec((None, C, HW), lambda n: (n, 0, 0)),
        ],
        # Lane-dense output slab; [:, :W] is sliced off in the wrapper.
        out_specs=pl.BlockSpec((None, H, LANES), lambda n: (n, 0, 0)),
        scratch_shapes=[
            pltpu.VMEM((HP, 2 * LANES), jnp.float32),   # padded (avg|max) maps
            pltpu.VMEM((2, HW), jnp.float32),           # reduced-map staging
        ],
        compiler_params=pltpu.CompilerParams(
            dimension_semantics=("parallel",),   # batch steps are independent
            vmem_limit_bytes=32 * 1024 * 1024,   # within v7x scoped default
        ),
    )(band, x_flat)
    return out[:, :, :W].reshape(N, 1, H, W)


def _reference(x, weight):
    avg = jnp.mean(x, axis=1, keepdims=True)
    mx = jnp.max(x, axis=1, keepdims=True)
    cat = jnp.concatenate([avg, mx], axis=1)
    y = jax.lax.conv_general_dilated(
        cat, weight, window_strides=(1, 1),
        padding=((PAD, PAD), (PAD, PAD)),
        dimension_numbers=("NCHW", "OIHW", "NCHW"))
    return jax.nn.sigmoid(y)


if __name__ == "__main__":
    key = jax.random.PRNGKey(0)
    kx, kw = jax.random.split(key)

    N, C, H, W = 2, 4, 16, 16
    x = jax.random.normal(kx, (N, C, H, W), dtype=jnp.float32)
    # Conv2d(2, 1, 7, bias=False) weight -> (1, 2, 7, 7)
    fan_in = 2 * KSIZE * KSIZE
    weight = jax.random.normal(kw, (1, 2, KSIZE, KSIZE),
                               dtype=jnp.float32) / jnp.sqrt(fan_in)

    out = jax.block_until_ready(spatial_attention(x, weight))
    ref = jax.block_until_ready(_reference(x, weight))

    assert out.shape == (N, 1, H, W)
    # bf16 MXU operands (and the XLA reference conv's own reduced-precision
    # passes) leave a few e-3 of absolute error on the sigmoid map; 2e-2 gives
    # ample margin while still catching formulation bugs (O(0.1) errors).
    err = jnp.max(jnp.abs(out - ref))
    assert jnp.allclose(out, ref, atol=2e-2, rtol=0.0), (
        f"mismatch vs reference: max abs diff {err:.3e}")

    print("KERNEL_OK")
</pallas_src>

<mosaic_0001>
module attributes {stable_mosaic.version = 11 : i64} {
  func.func @_spatial_attention_kernel(%arg0: i32, %arg1: memref<256x896xbf16, #tpu.memory_space<vmem>>, %arg2: memref<1x4x256xf32, #tpu.memory_space<vmem>>, %arg3: memref<1x16x128xf32, #tpu.memory_space<vmem>>, %arg4: memref<22x256xf32, #tpu.memory_space<vmem>>, %arg5: memref<2x256xf32, #tpu.memory_space<vmem>>) attributes {dimension_semantics = [#tpu.dimension_semantics<parallel>], iteration_bounds = array<i64: 2>, scalar_prefetch = 0 : i64, scratch_operands = 2 : i64, tpu.core_type = #tpu.core_type<tc>, window_params = [{pipeline_mode = #tpu.pipeline_mode<synchronous>, transform_indices = @transform_0, window_bounds = array<i64: 256, 896>}, {transform_indices = @transform_1, window_bounds = array<i64: 1, 4, 256>}, {transform_indices = @transform_2, window_bounds = array<i64: 1, 16, 128>}]} {
    %c0_i32 = arith.constant 0 : i32
    %0 = arith.cmpi eq, %arg0, %c0_i32 : i32
    %1 = arith.extui %0 : i1 to i32
    %c0_i32_0 = arith.constant 0 : i32
    %2 = arith.cmpi ne, %1, %c0_i32_0 : i32
    scf.if %2 {
      %cst_115 = arith.constant 0.000000e+00 : f32
      %102 = vector.broadcast %cst_115 : f32 to vector<22x256xf32>
      %c0_116 = arith.constant 0 : index
      %c0_117 = arith.constant 0 : index
      %103 = vector.load %arg4[%c0_116, %c0_117] : memref<22x256xf32, #tpu.memory_space<vmem>>, vector<22x256xf32>
      tpu.vector_store %arg4[%c0_116, %c0_117], %102 {strides = array<i32>} : memref<22x256xf32, #tpu.memory_space<vmem>>, vector<22x256xf32>,
    } else {
    }
    %c0 = arith.constant 0 : index
    %c0_1 = arith.constant 0 : index
    %c0_2 = arith.constant 0 : index
    %3 = vector.load %arg2[%c0, %c0_1, %c0_2] : memref<1x4x256xf32, #tpu.memory_space<vmem>>, vector<1x4x256xf32>
    %4 = vector.shape_cast %3 : vector<1x4x256xf32> to vector<4x256xf32>
    %cst = arith.constant dense<0.000000e+00> : vector<256xf32>
    %5 = vector.multi_reduction <add>, %4, %cst [0] : vector<4x256xf32> to vector<256xf32>
    %6 = vector.shape_cast %5 : vector<256xf32> to vector<1x256xf32>
    %cst_3 = arith.constant 2.500000e-01 : f32
    %7 = vector.broadcast %cst_3 : f32 to vector<1x256xf32>
    %8 = arith.mulf %6, %7 : vector<1x256xf32>
    %c0_4 = arith.constant 0 : index
    %c0_5 = arith.constant 0 : index
    %9 = vector.load %arg5[%c0_4, %c0_5] : memref<2x256xf32, #tpu.memory_space<vmem>>, vector<1x256xf32>
    tpu.vector_store %arg5[%c0_4, %c0_5], %8 {strides = array<i32>} : memref<2x256xf32, #tpu.memory_space<vmem>>, vector<1x256xf32>,
    %cst_6 = arith.constant dense<0xFF800000> : vector<256xf32>
    %10 = vector.multi_reduction <maximumf>, %4, %cst_6 [0] : vector<4x256xf32> to vector<256xf32>
    %11 = vector.shape_cast %10 : vector<256xf32> to vector<1x256xf32>
    %c1 = arith.constant 1 : index
    %c0_7 = arith.constant 0 : index
    %12 = vector.load %arg5[%c1, %c0_7] : memref<2x256xf32, #tpu.memory_space<vmem>>, vector<1x256xf32>
    tpu.vector_store %arg5[%c1, %c0_7], %11 {strides = array<i32>} : memref<2x256xf32, #tpu.memory_space<vmem>>, vector<1x256xf32>,
    %c0_8 = arith.constant 0 : index
    %c0_9 = arith.constant 0 : index
    %13 = vector.load %arg5[%c0_8, %c0_9] : memref<2x256xf32, #tpu.memory_space<vmem>>, vector<1x16xf32>
    %c3 = arith.constant 3 : index
    %c0_10 = arith.constant 0 : index
    %14 = vector.load %arg4[%c3, %c0_10] : memref<22x256xf32, #tpu.memory_space<vmem>>, vector<1x16xf32>
    tpu.vector_store %arg4[%c3, %c0_10], %13 {strides = array<i32>} : memref<22x256xf32, #tpu.memory_space<vmem>>, vector<1x16xf32>,
    %c1_11 = arith.constant 1 : index
    %c0_12 = arith.constant 0 : index
    %15 = vector.load %arg5[%c1_11, %c0_12] : memref<2x256xf32, #tpu.memory_space<vmem>>, vector<1x16xf32>
    %c3_13 = arith.constant 3 : index
    %c128 = arith.constant 128 : index
    %16 = vector.load %arg4[%c3_13, %c128] : memref<22x256xf32, #tpu.memory_space<vmem>>, vector<1x16xf32>
    tpu.vector_store %arg4[%c3_13, %c128], %15 {strides = array<i32>} : memref<22x256xf32, #tpu.memory_space<vmem>>, vector<1x16xf32>,
    %c0_14 = arith.constant 0 : index
    %c16 = arith.constant 16 : index
    %17 = vector.load %arg5[%c0_14, %c16] : memref<2x256xf32, #tpu.memory_space<vmem>>, vector<1x16xf32>
    %c4 = arith.constant 4 : index
    %c0_15 = arith.constant 0 : index
    %18 = vector.load %arg4[%c4, %c0_15] : memref<22x256xf32, #tpu.memory_space<vmem>>, vector<1x16xf32>
    tpu.vector_store %arg4[%c4, %c0_15], %17 {strides = array<i32>} : memref<22x256xf32, #tpu.memory_space<vmem>>, vector<1x16xf32>,
    %c1_16 = arith.constant 1 : index
    %c16_17 = arith.constant 16 : index
    %19 = vector.load %arg5[%c1_16, %c16_17] : memref<2x256xf32, #tpu.memory_space<vmem>>, vector<1x16xf32>
    %c4_18 = arith.constant 4 : index
    %c128_19 = arith.constant 128 : index
    %20 = vector.load %arg4[%c4_18, %c128_19] : memref<22x256xf32, #tpu.memory_space<vmem>>, vector<1x16xf32>
    tpu.vector_store %arg4[%c4_18, %c128_19], %19 {strides = array<i32>} : memref<22x256xf32, #tpu.memory_space<vmem>>, vector<1x16xf32>,
    %c0_20 = arith.constant 0 : index
    %c32 = arith.constant 32 : index
    %21 = vector.load %arg5[%c0_20, %c32] : memref<2x256xf32, #tpu.memory_space<vmem>>, vector<1x16xf32>
    %c5 = arith.constant 5 : index
    %c0_21 = arith.constant 0 : index
    %22 = vector.load %arg4[%c5, %c0_21] : memref<22x256xf32, #tpu.memory_space<vmem>>, vector<1x16xf32>
    tpu.vector_store %arg4[%c5, %c0_21], %21 {strides = array<i32>} : memref<22x256xf32, #tpu.memory_space<vmem>>, vector<1x16xf32>,
    %c1_22 = arith.constant 1 : index
    %c32_23 = arith.constant 32 : index
    %23 = vector.load %arg5[%c1_22, %c32_23] : memref<2x256xf32, #tpu.memory_space<vmem>>, vector<1x16xf32>
    %c5_24 = arith.constant 5 : index
    %c128_25 = arith.constant 128 : index
    %24 = vector.load %arg4[%c5_24, %c128_25] : memref<22x256xf32, #tpu.memory_space<vmem>>, vector<1x16xf32>
    tpu.vector_store %arg4[%c5_24, %c128_25], %23 {strides = array<i32>} : memref<22x256xf32, #tpu.memory_space<vmem>>, vector<1x16xf32>,
    %c0_26 = arith.constant 0 : index
    %c48 = arith.constant 48 : index
    %25 = vector.load %arg5[%c0_26, %c48] : memref<2x256xf32, #tpu.memory_space<vmem>>, vector<1x16xf32>
    %c6 = arith.constant 6 : index
    %c0_27 = arith.constant 0 : index
    %26 = vector.load %arg4[%c6, %c0_27] : memref<22x256xf32, #tpu.memory_space<vmem>>, vector<1x16xf32>
    tpu.vector_store %arg4[%c6, %c0_27], %25 {strides = array<i32>} : memref<22x256xf32, #tpu.memory_space<vmem>>, vector<1x16xf32>,
    %c1_28 = arith.constant 1 : index
    %c48_29 = arith.constant 48 : index
    %27 = vector.load %arg5[%c1_28, %c48_29] : memref<2x256xf32, #tpu.memory_space<vmem>>, vector<1x16xf32>
    %c6_30 = arith.constant 6 : index
    %c128_31 = arith.constant 128 : index
    %28 = vector.load %arg4[%c6_30, %c128_31] : memref<22x256xf32, #tpu.memory_space<vmem>>, vector<1x16xf32>
    tpu.vector_store %arg4[%c6_30, %c128_31], %27 {strides = array<i32>} : memref<22x256xf32, #tpu.memory_space<vmem>>, vector<1x16xf32>,
    %c0_32 = arith.constant 0 : index
    %c64 = arith.constant 64 : index
    %29 = vector.load %arg5[%c0_32, %c64] : memref<2x256xf32, #tpu.memory_space<vmem>>, vector<1x16xf32>
    %c7 = arith.constant 7 : index
    %c0_33 = arith.constant 0 : index
    %30 = vector.load %arg4[%c7, %c0_33] : memref<22x256xf32, #tpu.memory_space<vmem>>, vector<1x16xf32>
    tpu.vector_store %arg4[%c7, %c0_33], %29 {strides = array<i32>} : memref<22x256xf32, #tpu.memory_space<vmem>>, vector<1x16xf32>,
    %c1_34 = arith.constant 1 : index
    %c64_35 = arith.constant 64 : index
    %31 = vector.load %arg5[%c1_34, %c64_35] : memref<2x256xf32, #tpu.memory_space<vmem>>, vector<1x16xf32>
    %c7_36 = arith.constant 7 : index
    %c128_37 = arith.constant 128 : index
    %32 = vector.load %arg4[%c7_36, %c128_37] : memref<22x256xf32, #tpu.memory_space<vmem>>, vector<1x16xf32>
    tpu.vector_store %arg4[%c7_36, %c128_37], %31 {strides = array<i32>} : memref<22x256xf32, #tpu.memory_space<vmem>>, vector<1x16xf32>,
    %c0_38 = arith.constant 0 : index
    %c80 = arith.constant 80 : index
    %33 = vector.load %arg5[%c0_38, %c80] : memref<2x256xf32, #tpu.memory_space<vmem>>, vector<1x16xf32>
    %c8 = arith.constant 8 : index
    %c0_39 = arith.constant 0 : index
    %34 = vector.load %arg4[%c8, %c0_39] : memref<22x256xf32, #tpu.memory_space<vmem>>, vector<1x16xf32>
    tpu.vector_store %arg4[%c8, %c0_39], %33 {strides = array<i32>} : memref<22x256xf32, #tpu.memory_space<vmem>>, vector<1x16xf32>,
    %c1_40 = arith.constant 1 : index
    %c80_41 = arith.constant 80 : index
    %35 = vector.load %arg5[%c1_40, %c80_41] : memref<2x256xf32, #tpu.memory_space<vmem>>, vector<1x16xf32>
    %c8_42 = arith.constant 8 : index
    %c128_43 = arith.constant 128 : index
    %36 = vector.load %arg4[%c8_42, %c128_43] : memref<22x256xf32, #tpu.memory_space<vmem>>, vector<1x16xf32>
    tpu.vector_store %arg4[%c8_42, %c128_43], %35 {strides = array<i32>} : memref<22x256xf32, #tpu.memory_space<vmem>>, vector<1x16xf32>,
    %c0_44 = arith.constant 0 : index
    %c96 = arith.constant 96 : index
    %37 = vector.load %arg5[%c0_44, %c96] : memref<2x256xf32, #tpu.memory_space<vmem>>, vector<1x16xf32>
    %c9 = arith.constant 9 : index
    %c0_45 = arith.constant 0 : index
    %38 = vector.load %arg4[%c9, %c0_45] : memref<22x256xf32, #tpu.memory_space<vmem>>, vector<1x16xf32>
    tpu.vector_store %arg4[%c9, %c0_45], %37 {strides = array<i32>} : memref<22x256xf32, #tpu.memory_space<vmem>>, vector<1x16xf32>,
    %c1_46 = arith.constant 1 : index
    %c96_47 = arith.constant 96 : index
    %39 = vector.load %arg5[%c1_46, %c96_47] : memref<2x256xf32, #tpu.memory_space<vmem>>, vector<1x16xf32>
    %c9_48 = arith.constant 9 : index
    %c128_49 = arith.constant 128 : index
    %40 = vector.load %arg4[%c9_48, %c128_49] : memref<22x256xf32, #tpu.memory_space<vmem>>, vector<1x16xf32>
    tpu.vector_store %arg4[%c9_48, %c128_49], %39 {strides = array<i32>} : memref<22x256xf32, #tpu.memory_space<vmem>>, vector<1x16xf32>,
    %c0_50 = arith.constant 0 : index
    %c112 = arith.constant 112 : index
    %41 = vector.load %arg5[%c0_50, %c112] : memref<2x256xf32, #tpu.memory_space<vmem>>, vector<1x16xf32>
    %c10 = arith.constant 10 : index
    %c0_51 = arith.constant 0 : index
    %42 = vector.load %arg4[%c10, %c0_51] : memref<22x256xf32, #tpu.memory_space<vmem>>, vector<1x16xf32>
    tpu.vector_store %arg4[%c10, %c0_51], %41 {strides = array<i32>} : memref<22x256xf32, #tpu.memory_space<vmem>>, vector<1x16xf32>,
    %c1_52 = arith.constant 1 : index
    %c112_53 = arith.constant 112 : index
    %43 = vector.load %arg5[%c1_52, %c112_53] : memref<2x256xf32, #tpu.memory_space<vmem>>, vector<1x16xf32>
    %c10_54 = arith.constant 10 : index
    %c128_55 = arith.constant 128 : index
    %44 = vector.load %arg4[%c10_54, %c128_55] : memref<22x256xf32, #tpu.memory_space<vmem>>, vector<1x16xf32>
    tpu.vector_store %arg4[%c10_54, %c128_55], %43 {strides = array<i32>} : memref<22x256xf32, #tpu.memory_space<vmem>>, vector<1x16xf32>,
    %c0_56 = arith.constant 0 : index
    %c128_57 = arith.constant 128 : index
    %45 = vector.load %arg5[%c0_56, %c128_57] : memref<2x256xf32, #tpu.memory_space<vmem>>, vector<1x16xf32>
    %c11 = arith.constant 11 : index
    %c0_58 = arith.constant 0 : index
    %46 = vector.load %arg4[%c11, %c0_58] : memref<22x256xf32, #tpu.memory_space<vmem>>, vector<1x16xf32>
    tpu.vector_store %arg4[%c11, %c0_58], %45 {strides = array<i32>} : memref<22x256xf32, #tpu.memory_space<vmem>>, vector<1x16xf32>,
    %c1_59 = arith.constant 1 : index
    %c128_60 = arith.constant 128 : index
    %47 = vector.load %arg5[%c1_59, %c128_60] : memref<2x256xf32, #tpu.memory_space<vmem>>, vector<1x16xf32>
    %c11_61 = arith.constant 11 : index
    %c128_62 = arith.constant 128 : index
    %48 = vector.load %arg4[%c11_61, %c128_62] : memref<22x256xf32, #tpu.memory_space<vmem>>, vector<1x16xf32>
    tpu.vector_store %arg4[%c11_61, %c128_62], %47 {strides = array<i32>} : memref<22x256xf32, #tpu.memory_space<vmem>>, vector<1x16xf32>,
    %c0_63 = arith.constant 0 : index
    %c144 = arith.constant 144 : index
    %49 = vector.load %arg5[%c0_63, %c144] : memref<2x256xf32, #tpu.memory_space<vmem>>, vector<1x16xf32>
    %c12 = arith.constant 12 : index
    %c0_64 = arith.constant 0 : index
    %50 = vector.load %arg4[%c12, %c0_64] : memref<22x256xf32, #tpu.memory_space<vmem>>, vector<1x16xf32>
    tpu.vector_store %arg4[%c12, %c0_64], %49 {strides = array<i32>} : memref<22x256xf32, #tpu.memory_space<vmem>>, vector<1x16xf32>,
    %c1_65 = arith.constant 1 : index
    %c144_66 = arith.constant 144 : index
    %51 = vector.load %arg5[%c1_65, %c144_66] : memref<2x256xf32, #tpu.memory_space<vmem>>, vector<1x16xf32>
    %c12_67 = arith.constant 12 : index
    %c128_68 = arith.constant 128 : index
    %52 = vector.load %arg4[%c12_67, %c128_68] : memref<22x256xf32, #tpu.memory_space<vmem>>, vector<1x16xf32>
    tpu.vector_store %arg4[%c12_67, %c128_68], %51 {strides = array<i32>} : memref<22x256xf32, #tpu.memory_space<vmem>>, vector<1x16xf32>,
    %c0_69 = arith.constant 0 : index
    %c160 = arith.constant 160 : index
    %53 = vector.load %arg5[%c0_69, %c160] : memref<2x256xf32, #tpu.memory_space<vmem>>, vector<1x16xf32>
    %c13 = arith.constant 13 : index
    %c0_70 = arith.constant 0 : index
    %54 = vector.load %arg4[%c13, %c0_70] : memref<22x256xf32, #tpu.memory_space<vmem>>, vector<1x16xf32>
    tpu.vector_store %arg4[%c13, %c0_70], %53 {strides = array<i32>} : memref<22x256xf32, #tpu.memory_space<vmem>>, vector<1x16xf32>,
    %c1_71 = arith.constant 1 : index
    %c160_72 = arith.constant 160 : index
    %55 = vector.load %arg5[%c1_71, %c160_72] : memref<2x256xf32, #tpu.memory_space<vmem>>, vector<1x16xf32>
    %c13_73 = arith.constant 13 : index
    %c128_74 = arith.constant 128 : index
    %56 = vector.load %arg4[%c13_73, %c128_74] : memref<22x256xf32, #tpu.memory_space<vmem>>, vector<1x16xf32>
    tpu.vector_store %arg4[%c13_73, %c128_74], %55 {strides = array<i32>} : memref<22x256xf32, #tpu.memory_space<vmem>>, vector<1x16xf32>,
    %c0_75 = arith.constant 0 : index
    %c176 = arith.constant 176 : index
    %57 = vector.load %arg5[%c0_75, %c176] : memref<2x256xf32, #tpu.memory_space<vmem>>, vector<1x16xf32>
    %c14 = arith.constant 14 : index
    %c0_76 = arith.constant 0 : index
    %58 = vector.load %arg4[%c14, %c0_76] : memref<22x256xf32, #tpu.memory_space<vmem>>, vector<1x16xf32>
    tpu.vector_store %arg4[%c14, %c0_76], %57 {strides = array<i32>} : memref<22x256xf32, #tpu.memory_space<vmem>>, vector<1x16xf32>,
    %c1_77 = arith.constant 1 : index
    %c176_78 = arith.constant 176 : index
    %59 = vector.load %arg5[%c1_77, %c176_78] : memref<2x256xf32, #tpu.memory_space<vmem>>, vector<1x16xf32>
    %c14_79 = arith.constant 14 : index
    %c128_80 = arith.constant 128 : index
    %60 = vector.load %arg4[%c14_79, %c128_80] : memref<22x256xf32, #tpu.memory_space<vmem>>, vector<1x16xf32>
    tpu.vector_store %arg4[%c14_79, %c128_80], %59 {strides = array<i32>} : memref<22x256xf32, #tpu.memory_space<vmem>>, vector<1x16xf32>,
    %c0_81 = arith.constant 0 : index
    %c192 = arith.constant 192 : index
    %61 = vector.load %arg5[%c0_81, %c192] : memref<2x256xf32, #tpu.memory_space<vmem>>, vector<1x16xf32>
    %c15 = arith.constant 15 : index
    %c0_82 = arith.constant 0 : index
    %62 = vector.load %arg4[%c15, %c0_82] : memref<22x256xf32, #tpu.memory_space<vmem>>, vector<1x16xf32>
    tpu.vector_store %arg4[%c15, %c0_82], %61 {strides = array<i32>} : memref<22x256xf32, #tpu.memory_space<vmem>>, vector<1x16xf32>,
    %c1_83 = arith.constant 1 : index
    %c192_84 = arith.constant 192 : index
    %63 = vector.load %arg5[%c1_83, %c192_84] : memref<2x256xf32, #tpu.memory_space<vmem>>, vector<1x16xf32>
    %c15_85 = arith.constant 15 : index
    %c128_86 = arith.constant 128 : index
    %64 = vector.load %arg4[%c15_85, %c128_86] : memref<22x256xf32, #tpu.memory_space<vmem>>, vector<1x16xf32>
    tpu.vector_store %arg4[%c15_85, %c128_86], %63 {strides = array<i32>} : memref<22x256xf32, #tpu.memory_space<vmem>>, vector<1x16xf32>,
    %c0_87 = arith.constant 0 : index
    %c208 = arith.constant 208 : index
    %65 = vector.load %arg5[%c0_87, %c208] : memref<2x256xf32, #tpu.memory_space<vmem>>, vector<1x16xf32>
    %c16_88 = arith.constant 16 : index
    %c0_89 = arith.constant 0 : index
    %66 = vector.load %arg4[%c16_88, %c0_89] : memref<22x256xf32, #tpu.memory_space<vmem>>, vector<1x16xf32>
    tpu.vector_store %arg4[%c16_88, %c0_89], %65 {strides = array<i32>} : memref<22x256xf32, #tpu.memory_space<vmem>>, vector<1x16xf32>,
    %c1_90 = arith.constant 1 : index
    %c208_91 = arith.constant 208 : index
    %67 = vector.load %arg5[%c1_90, %c208_91] : memref<2x256xf32, #tpu.memory_space<vmem>>, vector<1x16xf32>
    %c16_92 = arith.constant 16 : index
    %c128_93 = arith.constant 128 : index
    %68 = vector.load %arg4[%c16_92, %c128_93] : memref<22x256xf32, #tpu.memory_space<vmem>>, vector<1x16xf32>
    tpu.vector_store %arg4[%c16_92, %c128_93], %67 {strides = array<i32>} : memref<22x256xf32, #tpu.memory_space<vmem>>, vector<1x16xf32>,
    %c0_94 = arith.constant 0 : index
    %c224 = arith.constant 224 : index
    %69 = vector.load %arg5[%c0_94, %c224] : memref<2x256xf32, #tpu.memory_space<vmem>>, vector<1x16xf32>
    %c17 = arith.constant 17 : index
    %c0_95 = arith.constant 0 : index
    %70 = vector.load %arg4[%c17, %c0_95] : memref<22x256xf32, #tpu.memory_space<vmem>>, vector<1x16xf32>
    tpu.vector_store %arg4[%c17, %c0_95], %69 {strides = array<i32>} : memref<22x256xf32, #tpu.memory_space<vmem>>, vector<1x16xf32>,
    %c1_96 = arith.constant 1 : index
    %c224_97 = arith.constant 224 : index
    %71 = vector.load %arg5[%c1_96, %c224_97] : memref<2x256xf32, #tpu.memory_space<vmem>>, vector<1x16xf32>
    %c17_98 = arith.constant 17 : index
    %c128_99 = arith.constant 128 : index
    %72 = vector.load %arg4[%c17_98, %c128_99] : memref<22x256xf32, #tpu.memory_space<vmem>>, vector<1x16xf32>
    tpu.vector_store %arg4[%c17_98, %c128_99], %71 {strides = array<i32>} : memref<22x256xf32, #tpu.memory_space<vmem>>, vector<1x16xf32>,
    %c0_100 = arith.constant 0 : index
    %c240 = arith.constant 240 : index
    %73 = vector.load %arg5[%c0_100, %c240] : memref<2x256xf32, #tpu.memory_space<vmem>>, vector<1x16xf32>
    %c18 = arith.constant 18 : index
    %c0_101 = arith.constant 0 : index
    %74 = vector.load %arg4[%c18, %c0_101] : memref<22x256xf32, #tpu.memory_space<vmem>>, vector<1x16xf32>
    tpu.vector_store %arg4[%c18, %c0_101], %73 {strides = array<i32>} : memref<22x256xf32, #tpu.memory_space<vmem>>, vector<1x16xf32>,
    %c1_102 = arith.constant 1 : index
    %c240_103 = arith.constant 240 : index
    %75 = vector.load %arg5[%c1_102, %c240_103] : memref<2x256xf32, #tpu.memory_space<vmem>>, vector<1x16xf32>
    %c18_104 = arith.constant 18 : index
    %c128_105 = arith.constant 128 : index
    %76 = vector.load %arg4[%c18_104, %c128_105] : memref<22x256xf32, #tpu.memory_space<vmem>>, vector<1x16xf32>
    tpu.vector_store %arg4[%c18_104, %c128_105], %75 {strides = array<i32>} : memref<22x256xf32, #tpu.memory_space<vmem>>, vector<1x16xf32>,
    %c0_106 = arith.constant 0 : index
    %c0_107 = arith.constant 0 : index
    %77 = vector.load %arg4[%c0_106, %c0_107] : memref<22x256xf32, #tpu.memory_space<vmem>>, vector<22x256xf32>
    %78 = arith.truncf %77 : vector<22x256xf32> to vector<22x256xbf16>
    %c0_108 = arith.constant 0 : index
    %c0_109 = arith.constant 0 : index
    %79 = vector.load %arg1[%c0_108, %c0_109] : memref<256x896xbf16, #tpu.memory_space<vmem>>, vector<256x896xbf16>
    %cst_110 = arith.constant dense<0.000000e+00> : vector<22x896xf32>
    %80 = tpu.matmul %78, %79, %cst_110 {dimension_numbers = #tpu.dot_dimension_numbers<[1], [0], [0], [1], [0, 0, 1, 1], [], []>} : vector<22x256xbf16>, vector<256x896xbf16>, vector<22x896xf32> -> vector<22x896xf32>
    %81 = vector.extract_strided_slice %80 {offsets = [0, 0], sizes = [16, 128], strides = [1, 1]} : vector<22x896xf32> to vector<16x128xf32>
    %82 = vector.extract_strided_slice %80 {offsets = [1, 128], sizes = [16, 128], strides = [1, 1]} : vector<22x896xf32> to vector<16x128xf32>
    %83 = vector.extract_strided_slice %80 {offsets = [2, 256], sizes = [16, 128], strides = [1, 1]} : vector<22x896xf32> to vector<16x128xf32>
    %84 = arith.addf %81, %83 : vector<16x128xf32>
    %85 = vector.extract_strided_slice %80 {offsets = [3, 384], sizes = [16, 128], strides = [1, 1]} : vector<22x896xf32> to vector<16x128xf32>
    %86 = arith.addf %82, %85 : vector<16x128xf32>
    %87 = vector.extract_strided_slice %80 {offsets = [4, 512], sizes = [16, 128], strides = [1, 1]} : vector<22x896xf32> to vector<16x128xf32>
    %88 = arith.addf %84, %87 : vector<16x128xf32>
    %89 = vector.extract_strided_slice %80 {offsets = [5, 640], sizes = [16, 128], strides = [1, 1]} : vector<22x896xf32> to vector<16x128xf32>
    %90 = arith.addf %86, %89 : vector<16x128xf32>
    %91 = vector.extract_strided_slice %80 {offsets = [6, 768], sizes = [16, 128], strides = [1, 1]} : vector<22x896xf32> to vector<16x128xf32>
    %92 = arith.addf %88, %91 : vector<16x128xf32>
    %93 = arith.addf %92, %90 : vector<16x128xf32>
    %94 = arith.negf %93 : vector<16x128xf32>
    %95 = math.exp %94 : vector<16x128xf32>
    %cst_111 = arith.constant 1.000000e+00 : f32
    %96 = vector.broadcast %cst_111 : f32 to vector<16x128xf32>
    %97 = arith.addf %96, %95 : vector<16x128xf32>
    %98 = arith.divf %96, %97 : vector<16x128xf32>
    %c0_112 = arith.constant 0 : index
    %c0_113 = arith.constant 0 : index
    %c0_114 = arith.constant 0 : index
    %99 = vector.load %arg3[%c0_112, %c0_113, %c0_114] : memref<1x16x128xf32, #tpu.memory_space<vmem>>, vector<1x16x128xf32>
    %100 = vector.shape_cast %99 : vector<1x16x128xf32> to vector<16x128xf32>
    %101 = vector.shape_cast %98 : vector<16x128xf32> to vector<1x16x128xf32>
    tpu.vector_store %arg3[%c0_112, %c0_113, %c0_114], %101 {strides = array<i32>} : memref<1x16x128xf32, #tpu.memory_space<vmem>>, vector<1x16x128xf32>,
    return
  }
  func.func @transform_0(%arg0: i32) -> (i32, i32) {
    %c0_i32 = arith.constant 0 : i32
    %c0_i32_0 = arith.constant 0 : i32
    %c0_i32_1 = arith.constant 0 : i32
    return %c0_i32, %c0_i32_0 : i32, i32
  }
  func.func @transform_1(%arg0: i32) -> (i32, i32, i32) {
    %c0_i32 = arith.constant 0 : i32
    %c0_i32_0 = arith.constant 0 : i32
    %c0_i32_1 = arith.constant 0 : i32
    return %arg0, %c0_i32, %c0_i32_0 : i32, i32, i32
  }
  func.func @transform_2(%arg0: i32) -> (i32, i32, i32) {
    %c0_i32 = arith.constant 0 : i32
    %c0_i32_0 = arith.constant 0 : i32
    %c0_i32_1 = arith.constant 0 : i32
    return %arg0, %c0_i32, %c0_i32_0 : i32, i32, i32
  }
}

</mosaic_0001>

<bundles_post_ra>
// kernel: tpu_custom_call.1
= control target key start
LH: loop header
LB: loop body
LE: loop exit
PB: predicated region body
PF: predicated region fallthrough
CT: control target
= control target key end

     0   :  { %7 = vsyncpa [#allocation5], 0  ;;  %s2559_s0 = inlined_call_operand.hbm [shape: bf16[256,896], index: 0, kind: input, shape index: {}]   ;;  %s2560_s1 = inlined_call_operand.hbm [shape: f32[2,4,256], index: 1, kind: input, shape index: {}]   ;;  %s2561_s2 = inlined_call_operand.hbm [shape: f32[2,16,128], index: 2, kind: output, shape index: {}]  }
   0x1   :  { %8 = vsyncpa [#allocation8], 0 }
   0x2   :  { %10 = vsyncpa [#allocation8 + $0x1], 0 }
   0x3   :  { %11 = vsyncpa [#allocation6], 0 }
   0x4   :  { %13 = vsyncpa [#allocation6 + $0x1], 0  ;;  %s2247_s9 = smov 0   ;;  %s2249_s10 = smov 0  }
   0x5   :  { %s2251_s11 = smov 0   ;;  %s2253_s12 = smov 0  }
   0x6 LB: > { %s2268_s13 = sadd.s32 4294967295, %s2214_s12   ;;  %s1659_s14 = sadd.s32 4294967294, %s2214_s12   ;;  %s2214_s12 = sphi %s2253_s12, %s2582_s12   ;;  %s2210_s11 = sphi %s2251_s11, %s2581_s11   ;;  %s2206_s10 = sphi %s2249_s10, %s2580_s10   ;;  %s2202_s9 = sphi %s2247_s9, %s2579_s9  }
   0x7   : > { %p60_p0 = scmp.ne.s32.totalorder %s2206_s10, %s2202_s9  ;;  %p2562_p1 = scmp.eq.s32.totalorder %s2268_s13, 0 }
   0x8   : > { %p90_p3 = scmp.eq.s32.totalorder %s1659_s14, 1  ;;  %p1660_p5 = scmp.ge.s32.totalorder %s2214_s12, 1 }
   0x9   : > { %p2277_p4 = por %p2562_p1, %p60_p0  ;;  %p97_p7 = scmp.lt.s32.totalorder %s2214_s12, 3 }
   0xa   : > { %p2282_p6 = por %p90_p3, %p60_p0  ;;  %s2216_s18 = smov [#allocation4]  }
   0xb   : > { %s2565_s15 = scalar_select %p2277_p4, 1, 0 }
   0xc   : > { %s2566_s16 = scalar_select %p2282_p6, 1, 0 }
   0xd   : > { %p2288_p9 = pnand %p1660_p5, %p97_p7  ;;  %s109_s19 = sshll.u32 %s2216_s18, 4  ;;  %s2292_s19 = int_to_ptr.vmem [resolvable:$true] %s109_s19 }
   0xe   : > { %s2304_s21 = sadd.s32 1, %s2214_s12   ;;  %s47_s22 = sadd.s32 1, %s2210_s11 }
   0xf   : > { %s2567_s17 = scalar_select %p2288_p9, 1, 0 }
  0x10   : > { %p1856_p10 = pneg %p2288_p9  ;;  %s44_s23 = ssub.s32 %s2214_s12, %s2304_s21 }
  0x11   : > { %s2086_s26 = scalar_lea.hbm %s2559_s0, 14336 }
  0x12   : > { %p2299_p12 = pnand %p1856_p10, %p2562_p1  ;;  %p2087_p13 = scmp.ne.s32.totalorder %s2559_s0, %s2086_s26 }
  0x13   : > { %p2093_p7 = scmp.lt.u32.totalorder %s2086_s26, %s2559_s0 }
  0x14   : > { %p2088_p0 = pneg %p2299_p12 }
  0x16   : > { %p2089_p3 = pnand %p2088_p0, %p2087_p13 }
  0x18   : > { %p2090_p5 = pneg %p2089_p3 }
  0x1a   : > { %p2095_p10 = pnand %p2093_p7, %p2090_p5 }
  0x1c   : > { %2098 = shalt.err (!%p2095_p10)
}
  0x1d   : > { %s2099_s3 = scalar_lea.vmem %s2292_s19, 14336  ;;  %p2107_p2 = scmp.lt.s32.totalorder %s2292_s19, %s2292_s19 }
  0x1e   : > { %p2100_p11 = scmp.ne.s32.totalorder %s2292_s19, %s2099_s3  ;;  %p2108_p6 = scmp.lt.s32.totalorder %s2099_s3, %s2099_s3 }
  0x20   : > { %p2102_p8 = pnand %p2100_p11, %p2088_p0  ;;  %p2109_p4 = por %p2108_p6, %p2107_p2 }
  0x22   : > { %p2103_p1 = pneg %p2102_p8 }
  0x24   : > { %p2110_p9 = pnand %p2109_p4, %p2103_p1 }
  0x26   : > { %2113 = shalt.err (!%p2110_p9)
}
  0x27   : > { %s2217_s4 = smov 448   ;;  %s2218_s5 = smov 28  }
  0x28   : > { %1859 = dma.hbm_to_vmem [thread:$0]  (!%p2299_p12), %s2559_s0, 14336, %s2292_s19, [#allocation5], %s2217_s4, %s2217_s4, %s2218_s5  }
  0x29   : > { %p45_p2 = scmp.eq.s32.totalorder %s44_s23, 0  ;;  %p54_p1 = scmp.ne.s32.totalorder %s2210_s11, %s2206_s10 }
  0x2a   : > { %p55_p4 = scmp.eq.s32.totalorder %s2214_s12, 0  ;;  %p1869_p6 = scmp.lt.s32.totalorder %s2214_s12, 2 }
  0x2b   : > { %s2335_s8 = scalar_select %p45_p2, %s2210_s11, %s47_s22  }
  0x2c   : > { %p56_p8 = por %p55_p4, %p54_p1  ;;  %p2569_p9 = scmp.eq.s32.totalorder %s2268_s13, 1 }
  0x2d   : > { %s123_s18 = sand.u32 1, %s2210_s11   ;;  %s1818_s24 = sshll.u32 %s2214_s12, 7 }
  0x2e   : > { %p2339_p11 = por %p2569_p9, %p54_p1  ;;  %s1663_s25 = sshll.u32 %s123_s18, 3 }
  0x2f   : > { %s2348_s27 = scalar_lea.hbm %s2560_s1, %s1818_s24  ;;  %s127_s19 = scalar_lea.vmem [#allocation7], %s1663_s25 }
  0x30   : > { %s135_s22 = sshll.u32 %s127_s19, 4  ;;  %p2350_p12 = pnand %p1869_p6, %p56_p8  ;;  %s2354_s22 = int_to_ptr.vmem [resolvable:$true] %s135_s22 }
  0x31   : > { %s124_s28 = scalar_lea.sflag [#allocation8], %s123_s18  ;;  %s2114_s29 = scalar_lea.hbm %s2348_s27, 128 }
  0x32   : > { %p2115_p13 = scmp.ne.s32.totalorder %s2348_s27, %s2114_s29  ;;  %p2116_p0 = pneg %p2350_p12 }
  0x33   : > { %s2119_s4 = scalar_lea.hbm %s2560_s1, 256  ;;  %p2120_p7 = scmp.lt.u32.totalorder %s2348_s27, %s2560_s1 }
  0x34   : > { %p2117_p3 = pnand %p2116_p0, %p2115_p13  ;;  %p2121_p10 = scmp.lt.u32.totalorder %s2119_s4, %s2114_s29 }
  0x35   : > { %p2123_p1 = scmp.lt.u32.totalorder %s2114_s29, %s2348_s27 }
  0x36   : > { %p2118_p5 = pneg %p2117_p3  ;;  %p2122_p2 = por %p2121_p10, %p2120_p7 }
  0x38   : > { %p2124_p4 = por %p2123_p1, %p2122_p2 }
  0x3a   : > { %p2125_p6 = pnand %p2124_p4, %p2118_p5 }
  0x3c   : > { %2128 = shalt.err (!%p2125_p6)
}
  0x3d   : > { %s2129_s7 = scalar_lea.vmem %s2354_s22, 128  ;;  %s2219_s18 = smov [#allocation7]  }
  0x3e   : > { %p2130_p8 = scmp.ne.s32.totalorder %s2354_s22, %s2129_s7  ;;  %s2134_s24 = sshll.u32 %s2219_s18, 4  ;;  %s2135_s24 = int_to_ptr.vmem [resolvable:$false] %s2134_s24 }
  0x3f   : > { %s2136_s25 = scalar_lea.vmem %s2135_s24, 256  ;;  %p2137_p3 = scmp.lt.s32.totalorder %s2354_s22, %s2135_s24 }
  0x40   : > { %p2132_p9 = pnand %p2130_p8, %p2116_p0  ;;  %p2138_p7 = scmp.lt.s32.totalorder %s2136_s25, %s2129_s7 }
  0x42   : > { %p2133_p13 = pneg %p2132_p9  ;;  %p2139_p10 = por %p2138_p7, %p2137_p3 }
  0x44   : > { %p2140_p2 = pnand %p2139_p10, %p2133_p13 }
  0x46   : > { %2143 = shalt.err (!%p2140_p2)
}
  0x47   : > { %1863 = dma.hbm_to_vmem [thread:$0]  (!%p2350_p12), %s2348_s27, 128, %s2354_s22, %s124_s28  }
  0x48   : > { %p2572_p5 = scmp.ne.s32.totalorder %s2567_s17, 0 }
  0x49   : > { %p2573_p0 = scmp.eq.s32.totalorder (!%p2572_p5), %s2268_s13, 0 }
  0x4a   : > { %144 = sbr.rel (%p2572_p5) target bundleno = 627 (0x273), region = 28 }
  0x51   : > { %2189 = dma.done.wait (%p2573_p0), [#allocation5], 14336   ;;  %p2574_p1 = pmov %p2573_p0 }
  0x52   : > { %s2388_s20 = sand.u32 1, %s2206_s10   ;;  %p2575_p4 = scmp.ne.s32.totalorder %s2565_s15, 0 }
  0x53   : > { %2191 = vsyncadd (%p2574_p1), [#allocation5], 4294952960  ;;  %s1668_s26 = sshll.u32 %s2388_s20, 3  ;;  %s151_s19 = scalar_lea.sflag [#allocation8], %s2388_s20 }
  0x54   : > { %s154_s23 = scalar_lea.vmem [#allocation7], %s1668_s26 }
  0x55   : > { %2193 = dma.done.wait (%p2575_p4), %s151_s19, 128  }
  0x56   : > { %2195 = vsyncadd (%p2575_p4), %s151_s19, 4294967168  ;;  %s1669_s17 = sshll.u32 %s2388_s20, 4  ;;  %p2576_p12 = scmp.ne.s32.totalorder %s2268_s13, 0 }
  0x57   : > { %s2397_s27 = scalar_lea.vmem [#allocation9], %s1669_s17  ;;  %v2220_v0 = vmov (!%p2576_p12), 0.0  }
  0x58   : > { %179 = sbr.rel (%p2576_p12) target bundleno = 95 (0x5f), region = 40  ;;  %180 = vst [vmem:[#allocation2] sm:$0xff] (!%p2576_p12), %v2220_v0  ;;  %181 = vst [vmem:[#allocation2 + $0x8] sm:$0xff] (!%p2576_p12), %v2220_v0 }
  0x59   : > { %182 = vst [vmem:[#allocation2 + $0x10] sm:$0xff] (!%p2576_p12), %v2220_v0  ;;  %183 = vst [vmem:[#allocation2 + $0x18] sm:$0xff] (!%p2576_p12), %v2220_v0 }
  0x5a   : > { %184 = vst [vmem:[#allocation2 + $0x20] sm:$0x3f] (!%p2576_p12), %v2220_v0  ;;  %185 = vst [vmem:[#allocation2 + $0x28] sm:$0x3f] (!%p2576_p12), %v2220_v0 }
  0x5f PF: > { %v186_v1 = vld [vmem:[%s154_s23] sm:$0xff]  ;;  %vm190_vm0 = vcmask 1043456   ;;  %v2221_v15 = vmov 1966171168   ;;  %v213_v17 = vlaneseq  ;;  %v1925_v24 = vld [vmem:[#allocation4 + $0x3c] ss:$28 sps:$4 sm:$0xff]  }
  0x60   : > { %v188_v2 = vcombine.high %v186_v1, %v186_v1  ;;  %v230_v3 = vsel %vm190_vm0, %v186_v1, -inf  ;;  %v191_v4 = vsel %vm190_vm0, %v186_v1, 0.0  ;;  %v1919_v9 = vld [vmem:[#allocation4 + $0x4] ss:$28 sps:$4 sm:$0xff]   ;;  %v1921_v14 = vld [vmem:[#allocation4 + $0xc] ss:$28 sps:$4 sm:$0xff]   ;;  %v211_v16 = vunpack.c.l.s4 %v2221_v15 }
  0x61   : > { %v231_v5 = vrot.slane %v230_v3, 4  ;;  %v192_v6 = vrot.slane %v191_v4, 4  ;;  %1267 = vmatprep.subr.bf16.mxu0 %v1919_v9  ;;  %v1923_v18 = vld [vmem:[#allocation4] ss:$28 sps:$4 sm:$0xff]   ;;  %v1924_v19 = vld [vmem:[#allocation4 + $0x8] ss:$28 sps:$4 sm:$0xff]   ;;  %1317 = vmatprep.subr.bf16.mxu1 %v1921_v14 }
  0x62   : > { %v237_v7 = vsel %vm190_vm0, %v188_v2, -inf  ;;  %v198_v8 = vsel %vm190_vm0, %v188_v2, 0.0  ;;  %1268 = vmatpush1.bf16.msra.mxu0 %v1923_v18  ;;  %1318 = vmatpush1.bf16.msra.mxu1 %v1924_v19  ;;  %v1927_v25 = vld [vmem:[#allocation4 + $0x44] ss:$28 sps:$4 sm:$0xff]   ;;  %v1929_v26 = vld [vmem:[#allocation4 + $0x38] ss:$28 sps:$4 sm:$0xff]   ;;  %v212_v33 = vunpack.c.0.s8 %v211_v16 }
  0x63   : > { %v232_v10 = vmax.f32 %v230_v3, %v231_v5  ;;  %v238_v11 = vrot.slane %v237_v7, 4  ;;  %v193_v12 = vadd.f32 %v192_v6, %v191_v4  ;;  %v199_v13 = vrot.slane %v198_v8, 4  ;;  %v1930_v27 = vld [vmem:[#allocation4 + $0x40] ss:$28 sps:$4 sm:$0xff]   ;;  %1269 = vmatprep.subr.bf16.mxu0 %v1925_v24  ;;  %v1931_v32 = vld [vmem:[#allocation4 + $0x74] ss:$28 sps:$4 sm:$0xff]   ;;  %1319 = vmatprep.subr.bf16.mxu1 %v1927_v25 }
  0x64   : > { %v214_v34 = vshrl.u32 %v213_v17, 7  ;;  %v1933_v35 = vld [vmem:[#allocation4 + $0x7c] ss:$28 sps:$4 sm:$0xff]   ;;  %v1935_v40 = vld [vmem:[#allocation4 + $0x70] ss:$28 sps:$4 sm:$0xff]   ;;  %vm227_vm1 = vcmp.lt.s32.totalorder %v213_v17, 256 }
  0x65   : > { %v233_v20 = vrot.slane %v232_v10, 2  ;;  %v239_v21 = vmax.f32 %v237_v7, %v238_v11  ;;  %v194_v22 = vrot.slane %v193_v12, 2  ;;  %v200_v23 = vadd.f32 %v199_v13, %v198_v8  ;;  %v1936_v41 = vld [vmem:[#allocation4 + $0x78] ss:$28 sps:$4 sm:$0xff]   ;;  %v1937_v42 = vld [vmem:[#allocation4 + $0xac] ss:$28 sps:$4 sm:$0xff]  }
  0x66   : > { %1270 = vmatpush1.bf16.msra.mxu0 %v1929_v26  ;;  %1320 = vmatpush1.bf16.msra.mxu1 %v1930_v27  ;;  %v1939_v47 = vld [vmem:[#allocation4 + $0xb4] ss:$28 sps:$4 sm:$0xff]   ;;  %v1941_v48 = vld [vmem:[#allocation4 + $0xa8] ss:$28 sps:$4 sm:$0xff]   ;;  %v215_v50 = vsub.s32 %v212_v33, %v214_v34  ;;  %v1947_v58 = vld [vmem:[#allocation4 + $0xe0] ss:$28 sps:$4 sm:$0xff]  }
  0x67   : > { %v234_v28 = vmax.f32 %v232_v10, %v233_v20  ;;  %v240_v29 = vrot.slane %v239_v21, 2  ;;  %v195_v30 = vadd.f32 %v194_v22, %v193_v12  ;;  %v201_v31 = vrot.slane %v200_v23, 2  ;;  %1271 = vmatprep.subr.bf16.mxu0 %v1931_v32  ;;  %1321 = vmatprep.subr.bf16.mxu1 %v1933_v35  ;;  %v1942_v49 = vld [vmem:[#allocation4 + $0xb0] ss:$28 sps:$4 sm:$0xff]   ;;  %v1943_v56 = vld [vmem:[#allocation4 + $0xe4] ss:$28 sps:$4 sm:$0xff]  }
  0x68   : > { %v1945_v57 = vld [vmem:[#allocation4 + $0xec] ss:$28 sps:$4 sm:$0xff]   ;;  %v1949_v0 = vld [vmem:[#allocation4 + $0x11c] ss:$28 sps:$4 sm:$0xff]   ;;  %v1951_v1 = vld [vmem:[#allocation4 + $0x124] ss:$28 sps:$4 sm:$0xff]  }
  0x69   : > { %v235_v36 = vrot.slane %v234_v28, 1  ;;  %v241_v37 = vmax.f32 %v239_v21, %v240_v29  ;;  %v196_v38 = vrot.slane %v195_v30, 1  ;;  %v202_v39 = vadd.f32 %v201_v31, %v200_v23  ;;  %v1948_v59 = vld [vmem:[#allocation4 + $0xe8] ss:$28 sps:$4 sm:$0xff]   ;;  %v1953_v2 = vld [vmem:[#allocation4 + $0x118] ss:$28 sps:$4 sm:$0xff]  }
  0x6a   : > { %1272 = vmatpush1.bf16.msra.mxu0 %v1935_v40  ;;  %1322 = vmatpush1.bf16.msra.mxu1 %v1936_v41  ;;  %v1954_v3 = vld [vmem:[#allocation4 + $0x120] ss:$28 sps:$4 sm:$0xff]   ;;  %v1955_v5 = vld [vmem:[#allocation4 + $0x154] ss:$28 sps:$4 sm:$0xff]   ;;  %v1961_v9 = vld [vmem:[#allocation4 + $0x18c] ss:$28 sps:$4 sm:$0xff]  }
  0x6b   : > { %v236_v43 = vmax.f32 %v234_v28, %v235_v36  ;;  %v242_v44 = vrot.slane %v241_v37, 1  ;;  %v197_v45 = vadd.f32 %v196_v38, %v195_v30  ;;  %v203_v46 = vrot.slane %v202_v39, 1  ;;  %1273 = vmatprep.subr.bf16.mxu0 %v1937_v42  ;;  %1323 = vmatprep.subr.bf16.mxu1 %v1939_v47  ;;  %v1957_v6 = vld [vmem:[#allocation4 + $0x15c] ss:$28 sps:$4 sm:$0xff]   ;;  %v1959_v7 = vld [vmem:[#allocation4 + $0x150] ss:$28 sps:$4 sm:$0xff]  }
  0x6c   : > { %v1960_v8 = vld [vmem:[#allocation4 + $0x158] ss:$28 sps:$4 sm:$0xff]   ;;  %s2222_s15 = smov 80   ;;  %s2223_s22 = smov 112   ;;  %vm265_vm2 = vcmask 122880   ;;  %v656_v31 = vld [vmem:[#allocation4 + $0x28c] sm:$0xff] }
  0x6d   : > { %v243_v51 = vmax.f32 %v241_v37, %v242_v44  ;;  %v204_v52 = vadd.f32 %v203_v46, %v202_v39  ;;  %v205_v53 = vmul.f32 0.25, %v197_v45  ;;  %v1963_v10 = vld [vmem:[#allocation4 + $0x194] ss:$28 sps:$4 sm:$0xff]   ;;  %v1965_v13 = vld [vmem:[#allocation4 + $0x188] ss:$28 sps:$4 sm:$0xff]   ;;  %s2224_s28 = smov 64  }
  0x6e   : > { %1274 = vmatpush1.bf16.msra.mxu0 %v1941_v48  ;;  %1324 = vmatpush1.bf16.msra.mxu1 %v1942_v49  ;;  %v1966_v14 = vld [vmem:[#allocation4 + $0x190] ss:$28 sps:$4 sm:$0xff]   ;;  %v1967_v15 = vld [vmem:[#allocation4 + $0x1c4] ss:$28 sps:$4 sm:$0xff]   ;;  %s2225_s29 = smov 96   ;;  %s2226_s30 = smov 32  }
  0x6f   : > { %v246_v54 = vcombine.low %v236_v43, %v243_v51  ;;  %v206_v55 = vmul.f32 0.25, %v204_v52  ;;  %1275 = vmatprep.subr.bf16.mxu0 %v1943_v56  ;;  %1325 = vmatprep.subr.bf16.mxu1 %v1945_v57  ;;  %v1969_v16 = vld [vmem:[#allocation4 + $0x1cc] ss:$28 sps:$4 sm:$0xff]   ;;  %v1971_v17 = vld [vmem:[#allocation4 + $0x1c0] ss:$28 sps:$4 sm:$0xff]   ;;  %s2227_s3 = smov 48  }
  0x70   : > { %v1972_v18 = vld [vmem:[#allocation4 + $0x1c8] ss:$28 sps:$4 sm:$0xff]   ;;  %v1973_v19 = vld [vmem:[#allocation4 + $0x1fc] ss:$28 sps:$4 sm:$0xff]   ;;  %v1979_v25 = vld [vmem:[#allocation4 + $0x234] ss:$28 sps:$4 sm:$0xff]  }
  0x71   : > { %v253_v60 = vrot.slane %v246_v54, %v215_v50  ;;  %v209_v61 = vcombine.low %v205_v53, %v206_v55  ;;  %v1975_v20 = vld [vmem:[#allocation4 + $0x204] ss:$28 sps:$4 sm:$0xff]   ;;  %v1977_v23 = vld [vmem:[#allocation4 + $0x1f8] ss:$28 sps:$4 sm:$0xff]   ;;  %v1983_v27 = vld [vmem:[#allocation4 + $0x230] ss:$28 sps:$4 sm:$0xff]  }
  0x72   : > { %1276 = vmatpush1.bf16.msra.mxu0 %v1947_v58  ;;  %1326 = vmatpush1.bf16.msra.mxu1 %v1948_v59  ;;  %v1978_v24 = vld [vmem:[#allocation4 + $0x200] ss:$28 sps:$4 sm:$0xff]   ;;  %v1984_v28 = vld [vmem:[#allocation4 + $0x238] ss:$28 sps:$4 sm:$0xff]   ;;  %s2228_s4 = smov 16   ;;  %vm1470_vm3 = vcmask 1045504  }
  0x73   : > { %v260_v62 = vrot.slane %v253_v60, %v215_v50  ;;  %v216_v63 = vrot.slane %v209_v61, %v215_v50  ;;  %1277 = vmatprep.subr.bf16.mxu0 %v1949_v0  ;;  %1327 = vmatprep.subr.bf16.mxu1 %v1951_v1  ;;  %v1981_v26 = vld [vmem:[#allocation4 + $0x23c] ss:$28 sps:$4 sm:$0xff]   ;;  %v1985_v29 = vld [vmem:[#allocation4 + $0x26c] ss:$28 sps:$4 sm:$0xff]   ;;  %v652_v30 = vld [vmem:[#allocation4 + $0x270] sm:$0xff]  ;;  %vm1523_vm4 = vcmask 1041408  }
  0x74   : > { %v1987_v33 = vld [vmem:[#allocation4 + $0x274] ss:$28 sps:$4 sm:$0xff]   ;;  %v1989_v34 = vld [vmem:[#allocation4 + $0x268] ss:$28 sps:$4 sm:$0xff]   ;;  %v1778_v36 = vcombine.low %v652_v30, %v656_v31  ;;  %v1994_v39 = vld [vmem:[#allocation4 + $0x2a0] ss:$28 sps:$4 sm:$0xff]  }
  0x75   : > { %263 = vst.msk [vmem:[#allocation3 + $0x1] ss:$2 sm:$0x3] %vm227_vm1, %v260_v62  ;;  %v223_v4 = vrot.slane %v216_v63, %v215_v50  ;;  %v1990_v37 = vld [vmem:[#allocation4 + $0x2a4] ss:$28 sps:$4 sm:$0xff]   ;;  %vm1536_vm5 = vcmask 1046528  }
  0x76   : > { %1278 = vmatpush1.bf16.msra.mxu0 %v1953_v2  ;;  %1328 = vmatpush1.bf16.msra.mxu1 %v1954_v3  ;;  %v1992_v38 = vld [vmem:[#allocation4 + $0x2ac] ss:$28 sps:$4 sm:$0xff]   ;;  %v1996_v41 = vld [vmem:[#allocation4 + $0x2dc] ss:$28 sps:$4 sm:$0xff]   ;;  %v1998_v42 = vld [vmem:[#allocation4 + $0x2e4] ss:$28 sps:$4 sm:$0xff]  }
  0x77   : > { %229 = vst.msk [vmem:[#allocation3] ss:$2 sm:$0x3] %vm227_vm1, %v223_v4  ;;  %1279 = vmatprep.subr.bf16.mxu0 %v1955_v5  ;;  %1329 = vmatprep.subr.bf16.mxu1 %v1957_v6  ;;  %v1995_v40 = vld [vmem:[#allocation4 + $0x2a8] ss:$28 sps:$4 sm:$0xff]   ;;  %s1819_s5 = sshll.u32 %s2268_s13, 8 }
  0x78   : > { %v2000_v43 = vld [vmem:[#allocation4 + $0x2d8] ss:$28 sps:$4 sm:$0xff]   ;;  %v2001_v44 = vld [vmem:[#allocation4 + $0x2e0] ss:$28 sps:$4 sm:$0xff]   ;;  %v2006_v48 = vld [vmem:[#allocation4 + $0x310] ss:$28 sps:$4 sm:$0xff]   ;;  %s2511_s24 = scalar_lea.hbm %s2561_s2, %s1819_s5 }
  0x79   : > { %v2002_v45 = vld [vmem:[#allocation4 + $0x314] ss:$28 sps:$4 sm:$0xff]   ;;  %v2004_v46 = vld [vmem:[#allocation4 + $0x31c] ss:$28 sps:$4 sm:$0xff]   ;;  %v2008_v50 = vld [vmem:[#allocation4 + $0x34c] ss:$28 sps:$4 sm:$0xff]  }
  0x7a   : > { %1280 = vmatpush1.bf16.msra.mxu0 %v1959_v7  ;;  %1330 = vmatpush1.bf16.msra.mxu1 %v1960_v8  ;;  %v2007_v49 = vld [vmem:[#allocation4 + $0x318] ss:$28 sps:$4 sm:$0xff]   ;;  %v2012_v53 = vld [vmem:[#allocation4 + $0x348] ss:$28 sps:$4 sm:$0xff]   ;;  %v2013_v54 = vld [vmem:[#allocation4 + $0x350] ss:$28 sps:$4 sm:$0xff]  }
  0x7b   : > { %1281 = vmatprep.subr.bf16.mxu0 %v1961_v9  ;;  %1331 = vmatprep.subr.bf16.mxu1 %v1963_v10  ;;  %v2010_v51 = vld [vmem:[#allocation4 + $0x354] ss:$28 sps:$4 sm:$0xff]   ;;  %v2019_v31 = vld [vmem:[#allocation4 + $0x48] ss:$28 sps:$4 sm:$0xff]   ;;  %s1574_s6 = sshll.u32 %s2397_s27, 4  ;;  %s1561_s25 = scalar_lea.sflag [#allocation6], %s2388_s20  ;;  %s2513_s6 = int_to_ptr.vmem [resolvable:$true] %s1574_s6 }
  0x7c   : > { %v1676_v11 = vld [vmem:[#allocation3 + $0x1] ss:$0 sm:$0xff]  ;;  %v411_v21 = vld [vmem:[#allocation3 + $0x3] sm:$0x1]  ;;  %v2016_v55 = vld [vmem:[#allocation4 + $0x14] ss:$28 sps:$4 sm:$0xff]  }
  0x7d   : > { %325 = vrot.lane.b32.xlu1 %v1676_v11, %s2222_s15  ;;  %285 = vrot.lane.b32.xlu0 %v1676_v11, %s2223_s22  ;;  %v267_v12 = vld [vmem:[#allocation3 + $0x1] sm:$0x1]  ;;  %v2410_v22 = vld [vmem:[#allocation3 + $0x3] ss:$0 sm:$0xff]  ;;  %412 = vst.msk [vmem:[#allocation2 + $0x1b] sm:$0x1] %vm265_vm2, %v411_v21 }
  0x7e   : > { %268 = vst.msk [vmem:[#allocation2 + $0xb] sm:$0x1] %vm265_vm2, %v267_v12  ;;  %1282 = vmatpush1.bf16.msra.mxu0 %v1965_v13  ;;  %1332 = vmatpush1.bf16.msra.mxu1 %v1966_v14  ;;  %v1671_v32 = vld [vmem:[#allocation3] ss:$0 sm:$0xff]  ;;  %v409_v47 = vld [vmem:[#allocation3 + $0x2] sm:$0x1] }
  0x7f   : > { %1283 = vmatprep.subr.bf16.mxu0 %v1967_v15  ;;  %1333 = vmatprep.subr.bf16.mxu1 %v1969_v16  ;;  %v264_v35 = vld [vmem:[#allocation3] sm:$0x1]  ;;  %410 = vst.msk [vmem:[#allocation2 + $0x13] sm:$0x1] %vm265_vm2, %v409_v47  ;;  %v1685_v52 = vld [vmem:[#allocation3 + $0x2] ss:$0 sm:$0xff] }
  0x80   : > { %266 = vst.msk [vmem:[#allocation2 + $0x3] sm:$0x1] %vm265_vm2, %v264_v35  ;;  %v2017_v56 = vld [vmem:[#allocation4 + $0x1d8] ss:$28 sps:$4 sm:$0xff]   ;;  %v2024_v35 = vld [vmem:[#allocation4 + $0x80] ss:$28 sps:$4 sm:$0xff]  }
  0x81   : > { %345 = vrot.lane.b32.xlu1 %v1676_v11, %s2224_s28  ;;  %305 = vrot.lane.b32.xlu0 %v1676_v11, %s2225_s29  ;;  %v2034_v47 = vld [vmem:[#allocation4 + $0xf0] ss:$28 sps:$4 sm:$0xff]   ;;  %s2144_s26 = scalar_lea.vmem %s2513_s6, 256  ;;  %s2229_s13 = smov [#allocation9]  }
  0x82   : > { %1284 = vmatpush1.bf16.msra.mxu0 %v1971_v17  ;;  %1334 = vmatpush1.bf16.msra.mxu1 %v1972_v18  ;;  %p2145_p6 = scmp.ne.s32.totalorder %s2513_s6, %s2144_s26  ;;  %s2148_s19 = sshll.u32 %s2229_s13, 4  ;;  %s2149_s19 = int_to_ptr.vmem [resolvable:$false] %s2148_s19 }
  0x83   : > { %1285 = vmatprep.subr.bf16.mxu0 %v1973_v19  ;;  %1335 = vmatprep.subr.bf16.mxu1 %v1975_v20  ;;  %v2014_v20 = vld [vmem:[#allocation4 + $0x10] ss:$28 sps:$4 sm:$0xff]   ;;  %s2150_s23 = scalar_lea.vmem %s2149_s19, 512  ;;  %p2151_p13 = scmp.lt.s32.totalorder %s2513_s6, %s2149_s19 }
  0x84   : > { %p2146_p8 = pnand %p2145_p6, %p2339_p11  ;;  %p2152_p3 = scmp.lt.s32.totalorder %s2150_s23, %s2144_s26 }
  0x85   : > { %385 = vrot.lane.b32.xlu1 %v1676_v11, %s2226_s30  ;;  %365 = vrot.lane.b32.xlu0 %v1676_v11, %s2227_s3 }
  0x86   : > { %1286 = vmatpush1.bf16.msra.mxu0 %v1977_v23  ;;  %1336 = vmatpush1.bf16.msra.mxu1 %v1978_v24  ;;  %p2147_p9 = pneg %p2146_p8  ;;  %p2153_p7 = por %p2152_p3, %p2151_p13 }
  0x87   : > { %1287 = vmatprep.subr.bf16.mxu0 %v1979_v25  ;;  %1337 = vmatprep.subr.bf16.mxu1 %v1981_v26  ;;  %v2018_v25 = vld [vmem:[#allocation4 + $0x18] ss:$28 sps:$4 sm:$0xff]  }
  0x88   : > { %p2154_p10 = pnand %p2153_p7, %p2147_p9 }
  0x89   : > { %429 = vrot.lane.b32.xlu1 %v2410_v22, %s2223_s22  ;;  %405 = vrot.lane.b32.xlu0 %v1676_v11, %s2228_s4 }
  0x8a   : > { %1288 = vmatpush1.bf16.msra.mxu0 %v1983_v27  ;;  %1338 = vmatpush1.bf16.msra.mxu1 %v1984_v28  ;;  %v2021_v27 = vld [vmem:[#allocation4 + $0x4c] ss:$28 sps:$4 sm:$0xff]  }
  0x8b   : > { %1289 = vmatprep.subr.bf16.mxu0 %v1985_v29  ;;  %1339 = vmatprep.subr.bf16.mxu1 %v1987_v33  ;;  %v2022_v28 = vld [vmem:[#allocation4 + $0x210] ss:$28 sps:$4 sm:$0xff]   ;;  %v2026_v33 = vld [vmem:[#allocation4 + $0x84] ss:$28 sps:$4 sm:$0xff]  }
  0x8d   : > { %469 = vrot.lane.b32.xlu1 %v2410_v22, %s2222_s15  ;;  %449 = vrot.lane.b32.xlu0 %v2410_v22, %s2225_s29 }
  0x8e   : > { %1290 = vmatpush1.bf16.msra.mxu0 %v1989_v34  ;;  %1340 = vmatpush1.bf16.msra.mxu1 %v1778_v36  ;;  %v2027_v34 = vld [vmem:[#allocation4 + $0x248] ss:$28 sps:$4 sm:$0xff]  }
  0x8f   : > { %1291 = vmatprep.subr.bf16.mxu0 %v1990_v37  ;;  %1341 = vmatprep.subr.bf16.mxu1 %v1992_v38  ;;  %v2028_v36 = vld [vmem:[#allocation4 + $0x88] ss:$28 sps:$4 sm:$0xff]  }
  0x91   : > { %489 = vrot.lane.b32.xlu0 %v2410_v22, %s2224_s28  ;;  %275 = vrot.lane.b32.xlu1 %v1671_v32, %s2223_s22 }
  0x92   : > { %1292 = vmatpush1.bf16.msra.mxu0 %v1994_v39  ;;  %1342 = vmatpush1.bf16.msra.mxu1 %v1995_v40  ;;  %v2031_v39 = vld [vmem:[#allocation4 + $0xbc] ss:$28 sps:$4 sm:$0xff]  }
  0x93   : > { %1293 = vmatprep.subr.bf16.mxu0 %v1996_v41  ;;  %1343 = vmatprep.subr.bf16.mxu1 %v1998_v42  ;;  %v2032_v40 = vld [vmem:[#allocation4 + $0x280] ss:$28 sps:$4 sm:$0xff]   ;;  %v2029_v41 = vld [vmem:[#allocation4 + $0xb8] ss:$28 sps:$4 sm:$0xff]  }
  0x95   : > { %295 = vrot.lane.b32.xlu0 %v1671_v32, %s2225_s29  ;;  %315 = vrot.lane.b32.xlu1 %v1671_v32, %s2222_s15 }
  0x96   : > { %1294 = vmatpush1.bf16.msra.mxu0 %v2000_v43  ;;  %1344 = vmatpush1.bf16.msra.mxu1 %v2001_v44  ;;  %v2033_v43 = vld [vmem:[#allocation4 + $0xc0] ss:$28 sps:$4 sm:$0xff]  }
  0x97   : > { %1295 = vmatprep.subr.bf16.mxu0 %v2002_v45  ;;  %1345 = vmatprep.subr.bf16.mxu1 %v2004_v46  ;;  %v2036_v45 = vld [vmem:[#allocation4 + $0xf4] ss:$28 sps:$4 sm:$0xff]  }
  0x98   : > { %v2037_v46 = vld [vmem:[#allocation4 + $0x2b8] ss:$28 sps:$4 sm:$0xff]  }
  0x99   : > { %335 = vrot.lane.b32.xlu0 %v1671_v32, %s2224_s28  ;;  %355 = vrot.lane.b32.xlu1 %v1671_v32, %s2227_s3 }
  0x9a   : > { %1296 = vmatpush1.bf16.msra.mxu0 %v2006_v48  ;;  %1346 = vmatpush1.bf16.msra.mxu1 %v2007_v49  ;;  %v2038_v48 = vld [vmem:[#allocation4 + $0xf8] ss:$28 sps:$4 sm:$0xff]   ;;  %v2041_v49 = vld [vmem:[#allocation4 + $0x12c] ss:$28 sps:$4 sm:$0xff]  }
  0x9b   : > { %1297 = vmatprep.subr.bf16.mxu0 %v2008_v50  ;;  %1347 = vmatprep.subr.bf16.mxu1 %v2010_v51  ;;  %v2042_v50 = vld [vmem:[#allocation4 + $0x2f0] ss:$28 sps:$4 sm:$0xff]   ;;  %v2039_v51 = vld [vmem:[#allocation4 + $0x128] ss:$28 sps:$4 sm:$0xff]  }
  0x9d   : > { %375 = vrot.lane.b32.xlu0 %v1671_v32, %s2226_s30  ;;  %395 = vrot.lane.b32.xlu1 %v1671_v32, %s2228_s4  ;;  %v2023_v32 = vld [vmem:[#allocation4 + $0x50] ss:$28 sps:$4 sm:$0xff]  }
  0x9e   : > { %1298 = vmatpush1.bf16.msra.mxu0 %v2012_v53  ;;  %1348 = vmatpush1.bf16.msra.mxu1 %v2013_v54  ;;  %v2046_v53 = vld [vmem:[#allocation4 + $0x164] ss:$28 sps:$4 sm:$0xff]  }
  0x9f   : > { %1368 = vmatprep.subr.bf16.mxu0 %v2016_v55  ;;  %1820 = vmatprep.subr.bf16.mxu1 %v2017_v56  ;;  %v2047_v54 = vld [vmem:[#allocation4 + $0x328] ss:$28 sps:$4 sm:$0xff]   ;;  %v2044_v55 = vld [vmem:[#allocation4 + $0x160] ss:$28 sps:$4 sm:$0xff]  }
  0xa0   : > { %v2048_v56 = vld [vmem:[#allocation4 + $0x168] ss:$28 sps:$4 sm:$0xff]  }
  0xa1   : > { %419 = vrot.lane.b32.xlu0 %v1685_v52, %s2223_s22  ;;  %439 = vrot.lane.b32.xlu1 %v1685_v52, %s2225_s29 }
  0xa5   : > { %459 = vrot.lane.b32.xlu0 %v1685_v52, %s2222_s15  ;;  %479 = vrot.lane.b32.xlu1 %v1685_v52, %s2224_s28 }
  0xa9   : > { %509 = vrot.lane.b32.xlu0 %v2410_v22, %s2227_s3  ;;  %529 = vrot.lane.b32.xlu1 %v2410_v22, %s2226_s30 }
  0xad   : > { %549 = vrot.lane.b32.xlu0 %v2410_v22, %s2228_s4  ;;  %499 = vrot.lane.b32.xlu1 %v1685_v52, %s2227_s3 }
  0xb1   : > { %519 = vrot.lane.b32.xlu0 %v1685_v52, %s2226_s30  ;;  %539 = vrot.lane.b32.xlu1 %v1685_v52, %s2228_s4  ;;  %v2043_v52 = vld [vmem:[#allocation4 + $0x130] ss:$28 sps:$4 sm:$0xff]  }
  0xef   : > { %v326_v57 = vpop.permute.xlu1 %325  ;;  %v286_v58 = vpop.permute.xlu0 %285 }
  0xf0   : > { %328 = vst.msk [vmem:[#allocation2 + $0xe] sm:$0x1] %vm265_vm2, %v326_v57  ;;  %288 = vst.msk [vmem:[#allocation2 + $0xc] sm:$0x1] %vm265_vm2, %v286_v58  ;;  %v2051_v57 = vld [vmem:[#allocation4 + $0x19c] ss:$28 sps:$4 sm:$0xff]  }
  0xf1   : > { %v2052_v58 = vld [vmem:[#allocation4 + $0x360] ss:$28 sps:$4 sm:$0xff]  }
  0xf3   : > { %v346_v59 = vpop.permute.xlu1 %345  ;;  %v306_v60 = vpop.permute.xlu0 %305 }
  0xf4   : > { %348 = vst.msk [vmem:[#allocation2 + $0xf] sm:$0x1] %vm265_vm2, %v346_v59  ;;  %308 = vst.msk [vmem:[#allocation2 + $0xd] sm:$0x1] %vm265_vm2, %v306_v60  ;;  %v2049_v59 = vld [vmem:[#allocation4 + $0x198] ss:$28 sps:$4 sm:$0xff]  }
  0xf5   : > { %v2053_v60 = vld [vmem:[#allocation4 + $0x1a0] ss:$28 sps:$4 sm:$0xff]  }
  0xf7   : > { %v386_v61 = vpop.permute.xlu1 %385  ;;  %v366_v62 = vpop.permute.xlu0 %365 }
  0xf8   : > { %388 = vst.msk [vmem:[#allocation2 + $0x19] sm:$0x1] %vm265_vm2, %v386_v61  ;;  %368 = vst.msk [vmem:[#allocation2 + $0x18] sm:$0x1] %vm265_vm2, %v366_v62  ;;  %v2056_v61 = vld [vmem:[#allocation4 + $0x1d4] ss:$28 sps:$4 sm:$0xff]  }
  0xf9   : > { %v2054_v62 = vld [vmem:[#allocation4 + $0x1d0] ss:$28 sps:$4 sm:$0xff]  }
  0xfb   : > { %v430_v63 = vpop.permute.xlu1 %429  ;;  %v406_v0 = vpop.permute.xlu0 %405  ;;  %v554_v9 = vld [vmem:[#allocation2 + $0x8] sm:$0xff] }
  0xfc   : > { %432 = vst.msk [vmem:[#allocation2 + $0x1c] sm:$0x1] %vm265_vm2, %v430_v63  ;;  %408 = vst.msk [vmem:[#allocation2 + $0x1a] sm:$0x1] %vm265_vm2, %v406_v0  ;;  %v2059_v63 = vld [vmem:[#allocation4 + $0x20c] ss:$28 sps:$4 sm:$0xff]  }
  0xfd   : > { %v2057_v0 = vld [vmem:[#allocation4 + $0x208] ss:$28 sps:$4 sm:$0xff]  }
  0xff   : > { %v470_v1 = vpop.permute.xlu1 %469  ;;  %v450_v2 = vpop.permute.xlu0 %449 }
 0x100   : > { %472 = vst.msk [vmem:[#allocation2 + $0x1e] sm:$0x1] %vm265_vm2, %v470_v1  ;;  %452 = vst.msk [vmem:[#allocation2 + $0x1d] sm:$0x1] %vm265_vm2, %v450_v2  ;;  %v2062_v1 = vld [vmem:[#allocation4 + $0x244] ss:$28 sps:$4 sm:$0xff]  }
 0x101   : > { %v2060_v2 = vld [vmem:[#allocation4 + $0x240] ss:$28 sps:$4 sm:$0xff]  }
 0x103   : > { %v490_v3 = vpop.permute.xlu0 %489  ;;  %v276_v4 = vpop.permute.xlu1 %275 }
 0x104   : > { %492 = vst.msk [vmem:[#allocation2 + $0x1f] sm:$0x1] %vm265_vm2, %v490_v3  ;;  %278 = vst.msk [vmem:[#allocation2 + $0x4] sm:$0x1] %vm265_vm2, %v276_v4  ;;  %v2065_v3 = vld [vmem:[#allocation4 + $0x27c] ss:$28 sps:$4 sm:$0xff]  }
 0x105   : > { %v2063_v4 = vld [vmem:[#allocation4 + $0x278] ss:$28 sps:$4 sm:$0xff]  }
 0x107   : > { %v296_v5 = vpop.permute.xlu0 %295  ;;  %v316_v6 = vpop.permute.xlu1 %315 }
 0x108   : > { %298 = vst.msk [vmem:[#allocation2 + $0x5] sm:$0x1] %vm265_vm2, %v296_v5  ;;  %318 = vst.msk [vmem:[#allocation2 + $0x6] sm:$0x1] %vm265_vm2, %v316_v6  ;;  %v2068_v5 = vld [vmem:[#allocation4 + $0x2b4] ss:$28 sps:$4 sm:$0xff]  }
 0x109   : > { %v2066_v6 = vld [vmem:[#allocation4 + $0x2b0] ss:$28 sps:$4 sm:$0xff]  }
 0x10b   : > { %v336_v7 = vpop.permute.xlu0 %335  ;;  %v356_v8 = vpop.permute.xlu1 %355  ;;  %v556_v10 = vld [vmem:[#allocation2 + $0x18] sm:$0xff] }
 0x10c   : > { %338 = vst.msk [vmem:[#allocation2 + $0x7] sm:$0x1] %vm265_vm2, %v336_v7  ;;  %358 = vst.msk [vmem:[#allocation2 + $0x10] sm:$0x1] %vm265_vm2, %v356_v8  ;;  %v2462_v11 = vpack.c.bf16 %v556_v10, %v554_v9  ;;  %v2071_v7 = vld [vmem:[#allocation4 + $0x2ec] ss:$28 sps:$4 sm:$0xff]  }
 0x10d   : > { %v2069_v8 = vld [vmem:[#allocation4 + $0x2e8] ss:$28 sps:$4 sm:$0xff]   ;;  %v2072_v10 = vld [vmem:[#allocation4 + $0x320] ss:$28 sps:$4 sm:$0xff]  }
 0x10e   : > { %1299 = vmatprep.mubr.bf16.mxu0 %v2462_v11  ;;  %1349 = vmatprep.mubr.bf16.mxu1 %v2462_v11  ;;  %v2074_v9 = vld [vmem:[#allocation4 + $0x324] ss:$28 sps:$4 sm:$0xff]  }
 0x10f   : > { %v376_v12 = vpop.permute.xlu0 %375  ;;  %v396_v13 = vpop.permute.xlu1 %395 }
 0x110   : > { %378 = vst.msk [vmem:[#allocation2 + $0x11] sm:$0x1] %vm265_vm2, %v376_v12  ;;  %398 = vst.msk [vmem:[#allocation2 + $0x12] sm:$0x1] %vm265_vm2, %v396_v13  ;;  %v2075_v12 = vld [vmem:[#allocation4 + $0x358] ss:$28 sps:$4 sm:$0xff]  }
 0x113   : > { %v420_v14 = vpop.permute.xlu0 %419  ;;  %v440_v15 = vpop.permute.xlu1 %439  ;;  %v553_v23 = vld [vmem:[#allocation2] sm:$0xff] }
 0x114   : > { %422 = vst.msk [vmem:[#allocation2 + $0x14] sm:$0x1] %vm265_vm2, %v420_v14  ;;  %442 = vst.msk [vmem:[#allocation2 + $0x15] sm:$0x1] %vm265_vm2, %v440_v15 }
 0x117   : > { %v460_v16 = vpop.permute.xlu0 %459  ;;  %v480_v17 = vpop.permute.xlu1 %479 }
 0x118   : > { %462 = vst.msk [vmem:[#allocation2 + $0x16] sm:$0x1] %vm265_vm2, %v460_v16  ;;  %482 = vst.msk [vmem:[#allocation2 + $0x17] sm:$0x1] %vm265_vm2, %v480_v17 }
 0x11b   : > { %v510_v18 = vpop.permute.xlu0 %509  ;;  %v530_v19 = vpop.permute.xlu1 %529 }
 0x11c   : > { %512 = vst.msk [vmem:[#allocation2 + $0x28] sm:$0x1] %vm265_vm2, %v510_v18  ;;  %532 = vst.msk [vmem:[#allocation2 + $0x29] sm:$0x1] %vm265_vm2, %v530_v19 }
 0x11f   : > { %v550_v21 = vpop.permute.xlu0 %549  ;;  %v500_v22 = vpop.permute.xlu1 %499  ;;  %v555_v24 = vld [vmem:[#allocation2 + $0x10] sm:$0xff] }
 0x120   : > { %552 = vst.msk [vmem:[#allocation2 + $0x2a] sm:$0x1] %vm265_vm2, %v550_v21  ;;  %502 = vst.msk [vmem:[#allocation2 + $0x20] sm:$0x1] %vm265_vm2, %v500_v22  ;;  %v2476_v26 = vpack.c.bf16 %v555_v24, %v553_v23 }
 0x122   : > { %1300 = vmatmul.mubr.bf16.vlgmr.msra.gmra.mrb[0].mxu0 %v2476_v26  ;;  %1350 = vmatmul.mubr.bf16.vlgmr.msra.gmra.mrb[0].mxu1 %v2476_v26 }
 0x123   : > { %1369 = vmatpush1.bf16.msra.mxu0 %v2014_v20  ;;  %1821 = vmatpush3.bf16.msra.mxu1 %v2018_v25  ;;  %v520_v29 = vpop.permute.xlu0 %519  ;;  %v540_v30 = vpop.permute.xlu1 %539 }
 0x124   : > { %522 = vst.msk [vmem:[#allocation2 + $0x21] sm:$0x1] %vm265_vm2, %v520_v29  ;;  %542 = vst.msk [vmem:[#allocation2 + $0x22] sm:$0x1] %vm265_vm2, %v540_v30  ;;  %1370 = vmatprep.subr.bf16.mxu0 %v2021_v27  ;;  %1822 = vmatprep.subr.bf16.mxu1 %v2022_v28 }
 0x127   : > { %1371 = vmatpush1.bf16.msra.mxu0 %v2019_v31  ;;  %1823 = vmatpush3.bf16.msra.mxu1 %v2023_v32  ;;  %v558_v37 = vld [vmem:[#allocation2 + $0x28] sm:$0x3f] }
 0x128   : > { %1372 = vmatprep.subr.bf16.mxu0 %v2026_v33  ;;  %1824 = vmatprep.subr.bf16.mxu1 %v2027_v34  ;;  %v2482_v38 = vpack.c.bf16 %v558_v37, %v558_v37 }
 0x12a   : > { %1309 = vmatprep.mubr.bf16.mxu0 %v2482_v38  ;;  %1359 = vmatprep.mubr.bf16.mxu1 %v2482_v38 }
 0x12b   : > { %1373 = vmatpush1.bf16.msra.mxu0 %v2024_v35  ;;  %1825 = vmatpush3.bf16.msra.mxu1 %v2028_v36  ;;  %v557_v42 = vld [vmem:[#allocation2 + $0x20] sm:$0x3f] }
 0x12c   : > { %1374 = vmatprep.subr.bf16.mxu0 %v2031_v39  ;;  %1826 = vmatprep.subr.bf16.mxu1 %v2032_v40  ;;  %v2486_v44 = vpack.c.bf16 %v557_v42, %v557_v42 }
 0x12e   : > { %1310 = vmatmul.mubr.bf16.gmra.mrb[4].mxu0 %v2486_v44  ;;  %1360 = vmatmul.mubr.bf16.gmra.mrb[4].mxu1 %v2486_v44 }
 0x12f   : > { %1375 = vmatpush1.bf16.msra.mxu0 %v2029_v41  ;;  %1827 = vmatpush3.bf16.msra.mxu1 %v2033_v43 }
 0x130   : > { %1400 = vmatprep.mubr.bf16.mxu0 %v2462_v11  ;;  %1451 = vmatprep.mubr.bf16.mxu1 %v2462_v11  ;;  %v2077_v11 = vld [vmem:[#allocation4 + $0x35c] ss:$28 sps:$4 sm:$0xff]  }
 0x131   : > { %1376 = vmatprep.subr.bf16.mxu0 %v2036_v45  ;;  %1828 = vmatprep.subr.bf16.mxu1 %v2037_v46 }
 0x133   : > { %1377 = vmatpush1.bf16.msra.mxu0 %v2034_v47  ;;  %1829 = vmatpush3.bf16.msra.mxu1 %v2038_v48 }
 0x134   : > { %1378 = vmatprep.subr.bf16.mxu0 %v2041_v49  ;;  %1830 = vmatprep.subr.bf16.mxu1 %v2042_v50 }
 0x137   : > { %1379 = vmatpush1.bf16.msra.mxu0 %v2039_v51  ;;  %1831 = vmatpush3.bf16.msra.mxu1 %v2043_v52 }
 0x138   : > { %1380 = vmatprep.subr.bf16.mxu0 %v2046_v53  ;;  %1832 = vmatprep.subr.bf16.mxu1 %v2047_v54 }
 0x13b   : > { %1381 = vmatpush1.bf16.msra.mxu0 %v2044_v55  ;;  %1833 = vmatpush3.bf16.msra.mxu1 %v2048_v56 }
 0x13c   : > { %1382 = vmatprep.subr.bf16.mxu0 %v2051_v57  ;;  %1834 = vmatprep.subr.bf16.mxu1 %v2052_v58 }
 0x13f   : > { %1383 = vmatpush1.bf16.msra.mxu0 %v2049_v59  ;;  %1835 = vmatpush3.bf16.msra.mxu1 %v2053_v60 }
 0x140   : > { %1384 = vmatprep.subr.bf16.mxu0 %v2056_v61 }
 0x142   : > { %1452 = vmatmul.mubr.bf16.vlgmr.msra.gmra.mrb[8].mxu1 %v2476_v26 }
 0x143   : > { %1385 = vmatpush1.bf16.msra.mxu0 %v2054_v62  ;;  %1459 = vmatprep.mubr.bf16.mxu1 %v2482_v38 }
 0x144   : > { %1386 = vmatprep.subr.bf16.mxu0 %v2059_v63 }
 0x147   : > { %1387 = vmatpush1.bf16.msra.mxu0 %v2057_v0 }
 0x148   : > { %1388 = vmatprep.subr.bf16.mxu0 %v2062_v1 }
 0x14a   : > { %1460 = vmatmul.mubr.bf16.gmra.mrb[12].mxu1 %v2486_v44 }
 0x14b   : > { %1389 = vmatpush1.bf16.msra.mxu0 %v2060_v2 }
 0x14c   : > { %1390 = vmatprep.subr.bf16.mxu0 %v2065_v3 }
 0x14f   : > { %1391 = vmatpush1.bf16.msra.mxu0 %v2063_v4 }
 0x150   : > { %1392 = vmatprep.subr.bf16.mxu0 %v2068_v5 }
 0x153   : > { %1393 = vmatpush1.bf16.msra.mxu0 %v2066_v6 }
 0x154   : > { %1394 = vmatprep.subr.bf16.mxu0 %v2071_v7 }
 0x157   : > { %1395 = vmatpush1.bf16.msra.mxu0 %v2069_v8 }
 0x158   : > { %1396 = vmatprep.subr.bf16.mxu0 %v2074_v9 }
 0x15b   : > { %1397 = vmatpush1.bf16.msra.mxu0 %v2072_v10 }
 0x15c   : > { %1398 = vmatprep.subr.bf16.mxu0 %v2077_v11 }
 0x15f   : > { %1399 = vmatpush1.bf16.msra.mxu0 %v2075_v12 }
 0x162   : > { %1401 = vmatmul.mubr.bf16.vlgmr.msra.gmra.mrb[8].mxu0 %v2476_v26 }
 0x163   : > { %1410 = vmatprep.mubr.bf16.mxu0 %v2482_v38 }
 0x16a   : > { %1411 = vmatmul.mubr.bf16.gmra.mrb[12].mxu0 %v2486_v44 }
 0x1f5   : > { %v1301_v13 = vpop.f32.mrb[0].mxu0  ;;  %v1351_v14 = vpop.f32.mrb[0].mxu1 }
 0x1f6   : > { %v1303_v15 = vpop.f32.mrb[1].mxu0  ;;  %v1353_v16 = vpop.f32.mrb[1].mxu1  ;;  %v1471_v19 = vrot.slane %v1351_v14, 2 }
 0x1f7   : > { %v1305_v17 = vpop.f32.mrb[2].mxu0  ;;  %v1355_v18 = vpop.f32.mrb[2].mxu1  ;;  %v1483_v23 = vrot.slane %v1353_v16, 2 }
 0x1f8   : > { %v1472_v20 = vrot.slane %v1355_v18, 2  ;;  %v1307_v21 = vpop.f32.mrb[3].mxu0  ;;  %v1357_v22 = vpop.f32.mrb[3].mxu1 }
 0x1f9   : > { %v1484_v24 = vrot.slane %v1357_v22, 2 }
 0x1fa   : > { %v1473_v25 = vsel %vm1470_vm3, %v1471_v19, %v1472_v20 }
 0x1fb   : > { %v1478_v26 = vadd.f32 %v1473_v25, %v1301_v13  ;;  %v1485_v27 = vsel %vm1470_vm3, %v1483_v23, %v1484_v24 }
 0x1fc   : > { %v1491_v28 = vadd.f32 %v1485_v27, %v1303_v15 }
 0x201   : > { %v1361_v29 = vpop.f32.mrb[4].mxu1  ;;  %v1311_v30 = vpop.f32.mrb[4].mxu0 }
 0x202   : > { %v1474_v31 = vrot.slane %v1361_v29, 2  ;;  %v1363_v32 = vpop.f32.mrb[5].mxu1  ;;  %v1312_v33 = vpop.f32.mrb[5].mxu0 }
 0x203   : > { %v1486_v34 = vrot.slane %v1363_v32, 2  ;;  %v1365_v35 = vpop.f32.mrb[6].mxu1  ;;  %v1314_v36 = vpop.f32.mrb[6].mxu0 }
 0x204   : > { %v1475_v37 = vsel %vm1470_vm3, %v1472_v20, %v1474_v31  ;;  %v1366_v38 = vpop.f32.mrb[7].mxu1  ;;  %v1315_v39 = vpop.f32.mrb[7].mxu0 }
 0x205   : > { %v1479_v40 = vadd.f32 %v1475_v37, %v1305_v17  ;;  %v1487_v41 = vsel %vm1470_vm3, %v1484_v24, %v1486_v34  ;;  %v1493_v42 = vadd.f32 %v1486_v34, %v1312_v33 }
 0x206   : > { %v1492_v43 = vadd.f32 %v1487_v41, %v1307_v21 }
 0x215   : > { %v1836_v44 = vpop.f32.mrb[8].mxu1 }
 0x216   : > { %v1837_v45 = vpop.f32.mrb[9].mxu1 }
 0x217   : > { %v1838_v46 = vadd.f32 %v1837_v45, %v1836_v44  ;;  %v1839_v47 = vpop.f32.mrb[10].mxu1 }
 0x218   : > { %v1840_v48 = vpop.f32.mrb[11].mxu1 }
 0x219   : > { %v1841_v49 = vadd.f32 %v1840_v48, %v1839_v47  ;;  %v1524_v50 = vrot.slane %v1838_v46, 6 }
 0x21b   : > { %v1525_v51 = vrot.slane %v1841_v49, 6 }
 0x21d   : > { %v1526_v52 = vsel %vm1523_vm4, %v1524_v50, %v1525_v51  ;;  %v1842_v53 = vpop.f32.mrb[12].mxu1 }
 0x21e   : > { %v1843_v54 = vpop.f32.mrb[13].mxu1 }
 0x21f   : > { %v1844_v55 = vadd.f32 %v1843_v54, %v1842_v53  ;;  %v1845_v56 = vpop.f32.mrb[14].mxu1 }
 0x220   : > { %v1846_v57 = vpop.f32.mrb[15].mxu1 }
 0x221   : > { %v1527_v58 = vrot.slane %v1844_v55, 6 }
 0x223   : > { %v1528_v59 = vsel %vm1523_vm4, %v1525_v51, %v1527_v58 }
 0x235   : > { %v1402_v60 = vpop.f32.mrb[8].mxu0 }
 0x236   : > { %v1404_v61 = vpop.f32.mrb[9].mxu0  ;;  %v1497_v63 = vrot.slane %v1402_v60, 4 }
 0x237   : > { %v1406_v62 = vpop.f32.mrb[10].mxu0  ;;  %v1509_v2 = vrot.slane %v1404_v61, 4 }
 0x238   : > { %v1498_v0 = vrot.slane %v1406_v62, 4  ;;  %v1408_v1 = vpop.f32.mrb[11].mxu0 }
 0x239   : > { %v1510_v3 = vrot.slane %v1408_v1, 4 }
 0x23a   : > { %v1499_v4 = vsel %vm190_vm0, %v1497_v63, %v1498_v0 }
 0x23b   : > { %v1504_v5 = vadd.f32 %v1499_v4, %v1478_v26  ;;  %v1511_v6 = vsel %vm190_vm0, %v1509_v2, %v1510_v3 }
 0x23c   : > { %v1517_v7 = vadd.f32 %v1511_v6, %v1491_v28 }
 0x23d   : > { %v1531_v8 = vadd.f32 %v1526_v52, %v1504_v5  ;;  %v1412_v9 = vpop.f32.mrb[12].mxu0 }
 0x23e   : > { %v1500_v10 = vrot.slane %v1412_v9, 4  ;;  %v1414_v11 = vpop.f32.mrb[13].mxu0  ;;  %v1537_v22 = vrot.slane %v1517_v7, 1 }
 0x23f   : > { %v1512_v12 = vrot.slane %v1414_v11, 4  ;;  %v1416_v13 = vpop.f32.mrb[14].mxu0 }
 0x240   : > { %v1501_v14 = vsel %vm190_vm0, %v1498_v0, %v1500_v10  ;;  %v1417_v15 = vpop.f32.mrb[15].mxu0 }
 0x241   : > { %v1505_v16 = vadd.f32 %v1501_v14, %v1479_v40  ;;  %v1513_v17 = vsel %vm190_vm0, %v1510_v3, %v1512_v12  ;;  %v1519_v18 = vadd.f32 %v1512_v12, %v1493_v42 }
 0x242   : > { %v1518_v19 = vadd.f32 %v1513_v17, %v1492_v43 }
 0x243   : > { %v1532_v20 = vadd.f32 %v1528_v59, %v1505_v16  ;;  %v1540_v21 = vrot.slane %v1519_v18, 1 }
 0x244   : > { %v1538_v23 = vrot.slane %v1518_v19, 1 }
 0x246   : > { %v1539_v24 = vsel %vm1536_vm5, %v1537_v22, %v1538_v23  ;;  %v1541_v25 = vsel %vm1536_vm5, %v1538_v23, %v1540_v21 }
 0x247   : > { %v1544_v26 = vadd.f32 %v1539_v24, %v1531_v8  ;;  %v1545_v27 = vadd.f32 %v1541_v25, %v1532_v20 }
 0x249   : > { %v1811_v28 = vmul.f32 -1.442695, %v1544_v26  ;;  %v1812_v29 = vmul.f32 -1.442695, %v1545_v27 }
 0x24b   : > { %2078 = vpow2.f32 %v1811_v28 }
 0x24c   : > { %2080 = vpow2.f32 %v1812_v29 }
 0x255   : > { %v2079_v30 = vpop.eup %2078 }
 0x256   : > { %v2081_v31 = vpop.eup %2080  ;;  %v1552_v32 = vadd.f32 1.0, %v2079_v30 }
 0x257   : > { %v1553_v33 = vadd.f32 1.0, %v2081_v31 }
 0x258   : > { %2082 = vrcp.f32 %v1552_v32 }
 0x259   : > { %2084 = vrcp.f32 %v1553_v33 }
 0x262   : > { %v2083_v34 = vpop.eup %2082 }
 0x263   : > { %v2085_v35 = vpop.eup %2084  ;;  %1558 = vst [vmem:[%s2397_s27] sm:$0xff] %v2083_v34 }
 0x264   : > { %1559 = vst [vmem:[%s2397_s27 + $0x8] sm:$0xff] %v2085_v35 }
 0x265   : > { %2157 = shalt.err (!%p2154_p10)
}
 0x266   : > { %s2158_s17 = scalar_lea.hbm %s2511_s24, 256  ;;  %s2162_s22 = scalar_lea.hbm %s2561_s2, 512 }
 0x267   : > { %p2159_p2 = scmp.ne.s32.totalorder %s2511_s24, %s2158_s17  ;;  %p2163_p1 = scmp.lt.u32.totalorder %s2511_s24, %s2561_s2 }
 0x268   : > { %p2164_p4 = scmp.lt.u32.totalorder %s2162_s22, %s2158_s17  ;;  %p2166_p6 = scmp.lt.u32.totalorder %s2158_s17, %s2511_s24 }
 0x269   : > { %p2160_p5 = pnand %p2159_p2, %p2339_p11 }
 0x26a   : > { %p2165_p12 = por %p2164_p4, %p2163_p1 }
 0x26b   : > { %p2161_p0 = pneg %p2160_p5 }
 0x26c   : > { %p2167_p8 = por %p2166_p6, %p2165_p12 }
 0x26e   : > { %p2168_p9 = pnand %p2167_p8, %p2161_p0 }
 0x270   : > { %2171 = shalt.err (!%p2168_p9)
}
 0x271   : > { %s2230_s30 = smov 128   ;;  %s2231_s3 = smov 8  }
 0x272   : > { %1854 = dma.vmem_to_hbm [thread:$0]  (%p2339_p11), %s2513_s6, 256, %s2511_s24, %s1561_s25, %s2230_s30, %s2230_s30, %s2231_s3  }
 0x273 PF: > { %s1589_s4 = sand.u32 1, %s2202_s9   ;;  %p2577_p13 = scmp.ne.s32.totalorder %s2566_s16, 0 }
 0x274   : > { %p2578_p3 = scmp.ge.s32.totalorder %s2214_s12, 2  ;;  %s1590_s5 = scalar_lea.sflag [#allocation6], %s1589_s4 }
 0x276   : > { %p1865_p7 = pnand %p2578_p3, %p2577_p13 }
 0x278   : > { %2197 = dma.done.wait (!%p1865_p7), %s1590_s5, 256  }
 0x279   : > { %2199 = vsyncadd (!%p1865_p7), %s1590_s5, 4294967040  ;;  %p16_p10 = scmp.ge.s32.totalorder %s2304_s21, 4   ;;  %s2579_s9 = smov %s2206_s10 }
 0x27a   : > { %s2580_s10 = smov %s2210_s11  ;;  %s2581_s11 = smov %s2335_s8 }
 0x27b   : > { %s2582_s12 = smov %s2304_s21  ;;  %18 = sbr.rel (!%p16_p10) target bundleno = 6 (0x6), region = 83 }
 0x282   :  { %1595 = vsyncpa [#allocation5], 1 }
 0x283   :  { %1597 = vsyncpa [#allocation5 + $0x1], 1 }
 0x284   :  { %1598 = vsyncpa [#allocation8], 1 }
 0x285   :  { %1600 = vsyncpa [#allocation8 + $0x1], 1 }
 0x286   :  { %1601 = vsyncpa [#allocation6], 1 }
 0x287   :  { %1603 = vsyncpa [#allocation6 + $0x1], 1 }

</bundles_post_ra>
